<compile_context>
chip_gen: v6e
topology: v6e:2x2x1
jax: 0.10.0
libtpu: 0.0.40
codegen_flags: <defaults>
</compile_context>

<pallas_src>
import jax
import jax.numpy as jnp
import numpy as np
from jax import lax
from jax.experimental import pallas as pl
from jax.experimental.pallas import tpu as pltpu


def _bottleneck_kernel(x_ref, xt_ref, xb_ref,
                       w1_ref, b1_ref, w2_ref, b2_ref, w3_ref, b3_ref,
                       o_ref):
    """One (n, h-tile) grid step.

    x_ref : (1, TH, W, Cin)   current row tile (f32)
    xt_ref: (1, 1,  W, Cin)   row just above the tile (clamped at image top)
    xb_ref: (1, 1,  W, Cin)   row just below the tile (clamped at image bottom)
    w1_ref: (Cin, width)      bf16, bn1 scale folded in
    w2_ref: (9*width, width)  bf16, bn2 scale folded in, (dy, dx, cin) flattened
    w3_ref: (width, Cout)     bf16, bn3 scale folded in
    b*_ref: (1, C)            f32 folded biases
    o_ref : (1, TH, W, Cout)
    """
    _, TH, W, Cin = x_ref.shape
    width = w1_ref.shape[1]
    Cout = w3_ref.shape[1]

    i = pl.program_id(1)
    last = pl.num_programs(1) - 1

    x_mid = x_ref[0]                                                # (TH, W, Cin)
    x_ext = jnp.concatenate([xt_ref[0], x_mid, xb_ref[0]], axis=0)  # (TH+2, W, Cin)

    # ---- conv1 (1x1) + bn1 + relu over the tile + halo rows ----
    xf = x_ext.reshape((TH + 2) * W, Cin).astype(jnp.bfloat16)
    h1 = jnp.dot(xf, w1_ref[...], preferred_element_type=jnp.float32)
    h1 = jnp.maximum(h1 + b1_ref[...], 0.0).reshape(TH + 2, W, width)

    # Halo rows falling outside the image are the 3x3 conv's zero padding; the
    # pad is applied to bn1+relu output, so those rows must be exactly zero.
    row_ids = lax.broadcasted_iota(jnp.int32, (TH + 2, 1, 1), 0)
    pad_row = jnp.logical_or(jnp.logical_and(row_ids == 0, i == 0),
                             jnp.logical_and(row_ids == TH + 1, i == last))
    h1 = jnp.where(pad_row, 0.0, h1)

    # ---- conv2 (3x3, pad=1) + bn2 + relu as a single stacked-K matmul ----
    # Horizontal (W axis) shifts with zero padding at the image border.
    zcol = jnp.zeros((TH + 2, 1, width), jnp.float32)
    s_left = jnp.concatenate([zcol, h1[:, :W - 1, :]], axis=1)   # col c -> h1[c-1]
    s_right = jnp.concatenate([h1[:, 1:, :], zcol], axis=1)      # col c -> h1[c+1]
    shifts = (s_left.astype(jnp.bfloat16),
              h1.astype(jnp.bfloat16),
              s_right.astype(jnp.bfloat16))

    # Patch tensor (TH, W, 9*width); channel order (dy, dx, cin) matches the
    # host-side w2.reshape(9*width, width).
    patches = jnp.concatenate(
        [shifts[dx][dy:dy + TH] for dy in range(3) for dx in range(3)], axis=-1)
    h2 = jnp.dot(patches.reshape(TH * W, 9 * width), w2_ref[...],
                 preferred_element_type=jnp.float32)
    h2 = jnp.maximum(h2 + b2_ref[...], 0.0)                      # (TH*W, width)

    # ---- conv3 (1x1) + bn3 + residual add + relu ----
    h3 = jnp.dot(h2.astype(jnp.bfloat16), w3_ref[...],
                 preferred_element_type=jnp.float32)
    h3 = h3 + b3_ref[...]
    out = jnp.maximum(h3 + x_mid.reshape(TH * W, Cin), 0.0)      # Cin == Cout
    o_ref[...] = out.reshape(1, TH, W, Cout).astype(o_ref.dtype)


def _prepare_params(params):
    """Fold BN scales into conv weights (bf16) and keep f32 biases."""
    (w1, s1, b1, w2, s2, b2, w3, s3, b3) = params
    w1f = (w1 * s1).astype(jnp.bfloat16)                       # (Cin, width)
    w2f = (w2 * s2.reshape(1, 1, 1, -1)).reshape(-1, w2.shape[-1]).astype(jnp.bfloat16)
    w3f = (w3 * s3).astype(jnp.bfloat16)                       # (width, Cout)
    return (w1f, b1.astype(jnp.float32), w2f, b2.astype(jnp.float32),
            w3f, b3.astype(jnp.float32))


def _row_tile(h, cap=8):
    """Largest divisor of h not exceeding cap (row tile height)."""
    for t in range(min(h, cap), 0, -1):
        if h % t == 0:
            return t
    return h


def bottleneck_pallas_nhwc(x_nhwc, params, row_tile=8):
    """x_nhwc: (N, H, W, Cin) float32.  Returns (N, H, W, Cout) float32."""
    w1f, b1, w2f, b2, w3f, b3 = _prepare_params(params)
    N, H, W, Cin = x_nhwc.shape
    Cout = w3f.shape[1]
    assert Cin == Cout, "identity residual requires inplanes == planes*expansion"

    TH = _row_tile(H, row_tile)
    n_tiles = H // TH

    def xm_map(n, i):
        return (n, i, 0, 0)

    def xt_map(n, i):            # row above the tile, clamped (masked in kernel)
        return (n, jnp.maximum(i * TH - 1, 0), 0, 0)

    def xb_map(n, i):            # row below the tile, clamped (masked in kernel)
        return (n, jnp.minimum(i * TH + TH, H - 1), 0, 0)

    def const2(n, i):            # weights/biases stay VMEM-resident
        return (0, 0)

    out = pl.pallas_call(
        _bottleneck_kernel,
        out_shape=jax.ShapeDtypeStruct((N, H, W, Cout), jnp.float32),
        grid=(N, n_tiles),
        in_specs=[
            pl.BlockSpec((1, TH, W, Cin), xm_map),
            pl.BlockSpec((1, 1, W, Cin), xt_map),
            pl.BlockSpec((1, 1, W, Cin), xb_map),
            pl.BlockSpec(w1f.shape, const2),
            pl.BlockSpec(b1.shape, const2),
            pl.BlockSpec(w2f.shape, const2),
            pl.BlockSpec(b2.shape, const2),
            pl.BlockSpec(w3f.shape, const2),
            pl.BlockSpec(b3.shape, const2),
        ],
        out_specs=pl.BlockSpec((1, TH, W, Cout), xm_map),
        compiler_params=pltpu.CompilerParams(
            dimension_semantics=("parallel", "parallel"),
            vmem_limit_bytes=48 * 1024 * 1024,   # safe on v7x's 64 MiB VMEM too
        ),
    )(x_nhwc, x_nhwc, x_nhwc, w1f, b1, w2f, b2, w3f, b3)
    return out


def bottleneck_pallas(x_nchw, params, row_tile=8):
    """NCHW adapter for PyTorch-interface parity (transposes at the boundary).

    Production code should keep NHWC end-to-end and call
    bottleneck_pallas_nhwc directly.
    """
    x_nhwc = jnp.transpose(x_nchw, (0, 2, 3, 1))
    out = bottleneck_pallas_nhwc(x_nhwc, params, row_tile=row_tile)
    return jnp.transpose(out, (0, 3, 1, 2))


def make_params(key, inplanes, planes, base_width=64, groups=1):
    """Deterministic synthetic parameters matching Bottleneck.__init__ shapes."""
    expansion = 4
    width = int(planes * (base_width / 64.0)) * groups
    cout = planes * expansion
    ks = jax.random.split(key, 12)

    def bn_fold(kg, kb, km, kv, c, eps=1e-5):
        gamma = 1.0 + 0.1 * jax.random.normal(kg, (1, c), jnp.float32)
        beta = 0.1 * jax.random.normal(kb, (1, c), jnp.float32)
        mean = 0.1 * jax.random.normal(km, (1, c), jnp.float32)
        var = jnp.abs(jax.random.normal(kv, (1, c), jnp.float32)) + 0.5
        scale = gamma * lax.rsqrt(var + eps)
        bias = beta - mean * scale
        return scale, bias

    # conv weights stored channels-last:
    #   conv1: (Cin, width)   conv2: (3, 3, width_in, width_out)  conv3: (width, Cout)
    w1 = 0.1 * jax.random.normal(ks[0], (inplanes, width), jnp.float32)
    w2 = 0.1 * jax.random.normal(ks[1], (3, 3, width, width), jnp.float32)
    w3 = 0.1 * jax.random.normal(ks[2], (width, cout), jnp.float32)
    s1, b1 = bn_fold(ks[3], ks[4], ks[5], ks[6], width)
    s2, b2 = bn_fold(ks[7], ks[8], ks[9], ks[10], width)
    kg, kb, km, kv = jax.random.split(ks[11], 4)
    s3, b3 = bn_fold(kg, kb, km, kv, cout)
    return (w1, s1, b1, w2, s2, b2, w3, s3, b3)


def bottleneck_ref(x_nchw, params):
    """Pure-JAX f32 reference (NHWC internally) for verification."""
    (w1, s1, b1, w2, s2, b2, w3, s3, b3) = params
    x = jnp.transpose(x_nchw, (0, 2, 3, 1))
    h = jnp.einsum('nhwc,cd->nhwd', x, w1)
    h = jax.nn.relu(h * s1 + b1)
    h = lax.conv_general_dilated(h, w2, window_strides=(1, 1), padding='SAME',
                                 dimension_numbers=('NHWC', 'HWIO', 'NHWC'))
    h = jax.nn.relu(h * s2 + b2)
    h = jnp.einsum('nhwc,cd->nhwd', h, w3)
    h = h * s3 + b3
    out = jax.nn.relu(h + x)
    return jnp.transpose(out, (0, 3, 1, 2))


if __name__ == "__main__":
    key = jax.random.PRNGKey(0)
    kx, kp = jax.random.split(key)

    # inplanes must equal planes * expansion (=4) for the identity residual.
    N, planes, H, W = 2, 4, 16, 16
    inplanes = planes * 4                       # 16
    x = jax.random.normal(kx, (N, inplanes, H, W), jnp.float32)   # NCHW input
    params = make_params(kp, inplanes, planes)

    out = jax.block_until_ready(bottleneck_pallas(x, params))
    ref = jax.block_until_ready(bottleneck_ref(x, params))

    # bf16 matmul operands (f32 accumulation) -> relaxed tolerance vs f32 ref.
    np.testing.assert_allclose(np.asarray(out), np.asarray(ref),
                               rtol=5e-2, atol=5e-2)
    print("KERNEL_OK")
</pallas_src>

<mosaic_0001>
module attributes {stable_mosaic.version = 11 : i64} {
  func.func @_bottleneck_kernel(%arg0: i32, %arg1: i32, %arg2: memref<1x8x16x16xf32, #tpu.memory_space<vmem>>, %arg3: memref<1x1x16x16xf32, #tpu.memory_space<vmem>>, %arg4: memref<1x1x16x16xf32, #tpu.memory_space<vmem>>, %arg5: memref<16x4xbf16, #tpu.memory_space<vmem>>, %arg6: memref<1x4xf32, #tpu.memory_space<vmem>>, %arg7: memref<36x4xbf16, #tpu.memory_space<vmem>>, %arg8: memref<1x4xf32, #tpu.memory_space<vmem>>, %arg9: memref<4x16xbf16, #tpu.memory_space<vmem>>, %arg10: memref<1x16xf32, #tpu.memory_space<vmem>>, %arg11: memref<1x8x16x16xf32, #tpu.memory_space<vmem>>) attributes {dimension_semantics = [#tpu.dimension_semantics<parallel>, #tpu.dimension_semantics<parallel>], iteration_bounds = array<i64: 2, 2>, scalar_prefetch = 0 : i64, scratch_operands = 0 : i64, tpu.core_type = #tpu.core_type<tc>, window_params = [{transform_indices = @transform_0, window_bounds = array<i64: 1, 8, 16, 16>}, {transform_indices = @transform_1, window_bounds = array<i64: 1, 1, 16, 16>}, {transform_indices = @transform_2, window_bounds = array<i64: 1, 1, 16, 16>}, {pipeline_mode = #tpu.pipeline_mode<synchronous>, transform_indices = @transform_3, window_bounds = array<i64: 16, 4>}, {pipeline_mode = #tpu.pipeline_mode<synchronous>, transform_indices = @transform_4, window_bounds = array<i64: 1, 4>}, {pipeline_mode = #tpu.pipeline_mode<synchronous>, transform_indices = @transform_5, window_bounds = array<i64: 36, 4>}, {pipeline_mode = #tpu.pipeline_mode<synchronous>, transform_indices = @transform_6, window_bounds = array<i64: 1, 4>}, {pipeline_mode = #tpu.pipeline_mode<synchronous>, transform_indices = @transform_7, window_bounds = array<i64: 4, 16>}, {pipeline_mode = #tpu.pipeline_mode<synchronous>, transform_indices = @transform_8, window_bounds = array<i64: 1, 16>}, {transform_indices = @transform_9, window_bounds = array<i64: 1, 8, 16, 16>}]} {
    %c0 = arith.constant 0 : index
    %c0_0 = arith.constant 0 : index
    %c0_1 = arith.constant 0 : index
    %c0_2 = arith.constant 0 : index
    %0 = vector.load %arg2[%c0, %c0_0, %c0_1, %c0_2] : memref<1x8x16x16xf32, #tpu.memory_space<vmem>>, vector<1x8x16x16xf32>
    %1 = vector.shape_cast %0 : vector<1x8x16x16xf32> to vector<8x16x16xf32>
    %c0_3 = arith.constant 0 : index
    %c0_4 = arith.constant 0 : index
    %c0_5 = arith.constant 0 : index
    %c0_6 = arith.constant 0 : index
    %2 = vector.load %arg3[%c0_3, %c0_4, %c0_5, %c0_6] : memref<1x1x16x16xf32, #tpu.memory_space<vmem>>, vector<1x1x16x16xf32>
    %3 = vector.shape_cast %2 : vector<1x1x16x16xf32> to vector<1x16x16xf32>
    %c0_7 = arith.constant 0 : index
    %c0_8 = arith.constant 0 : index
    %c0_9 = arith.constant 0 : index
    %c0_10 = arith.constant 0 : index
    %4 = vector.load %arg4[%c0_7, %c0_8, %c0_9, %c0_10] : memref<1x1x16x16xf32, #tpu.memory_space<vmem>>, vector<1x1x16x16xf32>
    %5 = vector.shape_cast %4 : vector<1x1x16x16xf32> to vector<1x16x16xf32>
    %6 = tpu.concatenate %3, %1, %5 in 0 : vector<1x16x16xf32>, vector<8x16x16xf32>, vector<1x16x16xf32> -> vector<10x16x16xf32>
    %7 = vector.shape_cast %6 : vector<10x16x16xf32> to vector<160x16xf32>
    %8 = arith.truncf %7 : vector<160x16xf32> to vector<160x16xbf16>
    %c0_11 = arith.constant 0 : index
    %c0_12 = arith.constant 0 : index
    %9 = vector.load %arg5[%c0_11, %c0_12] : memref<16x4xbf16, #tpu.memory_space<vmem>>, vector<16x4xbf16>
    %cst = arith.constant dense<0.000000e+00> : vector<160x4xf32>
    %10 = tpu.matmul %8, %9, %cst {dimension_numbers = #tpu.dot_dimension_numbers<[1], [0], [0], [1], [0, 0, 1, 1], [], []>} : vector<160x16xbf16>, vector<16x4xbf16>, vector<160x4xf32> -> vector<160x4xf32>
    %c0_13 = arith.constant 0 : index
    %c0_14 = arith.constant 0 : index
    %11 = vector.load %arg6[%c0_13, %c0_14] : memref<1x4xf32, #tpu.memory_space<vmem>>, vector<1x4xf32>
    %12 = vector.broadcast %11 : vector<1x4xf32> to vector<160x4xf32>
    %13 = arith.addf %10, %12 : vector<160x4xf32>
    %cst_15 = arith.constant 0.000000e+00 : f32
    %14 = vector.broadcast %cst_15 : f32 to vector<160x4xf32>
    %15 = arith.maximumf %13, %14 : vector<160x4xf32>
    %16 = vector.shape_cast %15 : vector<160x4xf32> to vector<10x16x4xf32>
    %17 = tpu.iota {dimensions = array<i32: 0>} : vector<10x1x1xi32>
    %c0_i32 = arith.constant 0 : i32
    %18 = vector.broadcast %c0_i32 : i32 to vector<10x1x1xi32>
    %19 = arith.cmpi eq, %17, %18 : vector<10x1x1xi32>
    %c0_i32_16 = arith.constant 0 : i32
    %20 = arith.cmpi eq, %arg1, %c0_i32_16 : i32
    %21 = vector.broadcast %20 : i1 to vector<10x1x1xi1>
    %22 = arith.andi %19, %21 : vector<10x1x1xi1>
    %c9_i32 = arith.constant 9 : i32
    %23 = vector.broadcast %c9_i32 : i32 to vector<10x1x1xi32>
    %24 = arith.cmpi eq, %17, %23 : vector<10x1x1xi32>
    %c1_i32 = arith.constant 1 : i32
    %25 = arith.cmpi eq, %arg1, %c1_i32 : i32
    %26 = vector.broadcast %25 : i1 to vector<10x1x1xi1>
    %27 = arith.andi %24, %26 : vector<10x1x1xi1>
    %28 = arith.ori %22, %27 : vector<10x1x1xi1>
    %cst_17 = arith.constant 0.000000e+00 : f32
    %29 = vector.shape_cast %28 : vector<10x1x1xi1> to vector<10x1x1xi1>
    %30 = vector.broadcast %29 : vector<10x1x1xi1> to vector<10x16x4xi1>
    %31 = vector.broadcast %cst_17 : f32 to vector<10x16x4xf32>
    %32 = arith.select %30, %31, %16 : vector<10x16x4xi1>, vector<10x16x4xf32>
    %cst_18 = arith.constant 0.000000e+00 : f32
    %33 = vector.broadcast %cst_18 : f32 to vector<10x1x4xf32>
    %34 = vector.extract_strided_slice %32 {offsets = [0, 0, 0], sizes = [10, 15, 4], strides = [1, 1, 1]} : vector<10x16x4xf32> to vector<10x15x4xf32>
    %35 = tpu.concatenate %33, %34 in 1 : vector<10x1x4xf32>, vector<10x15x4xf32> -> vector<10x16x4xf32>
    %36 = vector.extract_strided_slice %32 {offsets = [0, 1, 0], sizes = [10, 15, 4], strides = [1, 1, 1]} : vector<10x16x4xf32> to vector<10x15x4xf32>
    %37 = tpu.concatenate %36, %33 in 1 : vector<10x15x4xf32>, vector<10x1x4xf32> -> vector<10x16x4xf32>
    %38 = arith.truncf %35 : vector<10x16x4xf32> to vector<10x16x4xbf16>
    %39 = arith.truncf %32 : vector<10x16x4xf32> to vector<10x16x4xbf16>
    %40 = arith.truncf %37 : vector<10x16x4xf32> to vector<10x16x4xbf16>
    %41 = vector.extract_strided_slice %38 {offsets = [0, 0, 0], sizes = [8, 16, 4], strides = [1, 1, 1]} : vector<10x16x4xbf16> to vector<8x16x4xbf16>
    %42 = vector.extract_strided_slice %39 {offsets = [0, 0, 0], sizes = [8, 16, 4], strides = [1, 1, 1]} : vector<10x16x4xbf16> to vector<8x16x4xbf16>
    %43 = vector.extract_strided_slice %40 {offsets = [0, 0, 0], sizes = [8, 16, 4], strides = [1, 1, 1]} : vector<10x16x4xbf16> to vector<8x16x4xbf16>
    %44 = vector.extract_strided_slice %38 {offsets = [1, 0, 0], sizes = [8, 16, 4], strides = [1, 1, 1]} : vector<10x16x4xbf16> to vector<8x16x4xbf16>
    %45 = vector.extract_strided_slice %39 {offsets = [1, 0, 0], sizes = [8, 16, 4], strides = [1, 1, 1]} : vector<10x16x4xbf16> to vector<8x16x4xbf16>
    %46 = vector.extract_strided_slice %40 {offsets = [1, 0, 0], sizes = [8, 16, 4], strides = [1, 1, 1]} : vector<10x16x4xbf16> to vector<8x16x4xbf16>
    %47 = vector.extract_strided_slice %38 {offsets = [2, 0, 0], sizes = [8, 16, 4], strides = [1, 1, 1]} : vector<10x16x4xbf16> to vector<8x16x4xbf16>
    %48 = vector.extract_strided_slice %39 {offsets = [2, 0, 0], sizes = [8, 16, 4], strides = [1, 1, 1]} : vector<10x16x4xbf16> to vector<8x16x4xbf16>
    %49 = vector.extract_strided_slice %40 {offsets = [2, 0, 0], sizes = [8, 16, 4], strides = [1, 1, 1]} : vector<10x16x4xbf16> to vector<8x16x4xbf16>
    %50 = tpu.concatenate %41, %42, %43, %44, %45, %46, %47, %48, %49 in 2 : vector<8x16x4xbf16>, vector<8x16x4xbf16>, vector<8x16x4xbf16>, vector<8x16x4xbf16>, vector<8x16x4xbf16>, vector<8x16x4xbf16>, vector<8x16x4xbf16>, vector<8x16x4xbf16>, vector<8x16x4xbf16> -> vector<8x16x36xbf16>
    %51 = vector.shape_cast %50 : vector<8x16x36xbf16> to vector<128x36xbf16>
    %c0_19 = arith.constant 0 : index
    %c0_20 = arith.constant 0 : index
    %52 = vector.load %arg7[%c0_19, %c0_20] : memref<36x4xbf16, #tpu.memory_space<vmem>>, vector<36x4xbf16>
    %cst_21 = arith.constant dense<0.000000e+00> : vector<128x4xf32>
    %53 = tpu.matmul %51, %52, %cst_21 {dimension_numbers = #tpu.dot_dimension_numbers<[1], [0], [0], [1], [0, 0, 1, 1], [], []>} : vector<128x36xbf16>, vector<36x4xbf16>, vector<128x4xf32> -> vector<128x4xf32>
    %c0_22 = arith.constant 0 : index
    %c0_23 = arith.constant 0 : index
    %54 = vector.load %arg8[%c0_22, %c0_23] : memref<1x4xf32, #tpu.memory_space<vmem>>, vector<1x4xf32>
    %55 = vector.broadcast %54 : vector<1x4xf32> to vector<128x4xf32>
    %56 = arith.addf %53, %55 : vector<128x4xf32>
    %cst_24 = arith.constant 0.000000e+00 : f32
    %57 = vector.broadcast %cst_24 : f32 to vector<128x4xf32>
    %58 = arith.maximumf %56, %57 : vector<128x4xf32>
    %59 = arith.truncf %58 : vector<128x4xf32> to vector<128x4xbf16>
    %c0_25 = arith.constant 0 : index
    %c0_26 = arith.constant 0 : index
    %60 = vector.load %arg9[%c0_25, %c0_26] : memref<4x16xbf16, #tpu.memory_space<vmem>>, vector<4x16xbf16>
    %cst_27 = arith.constant dense<0.000000e+00> : vector<128x16xf32>
    %61 = tpu.matmul %59, %60, %cst_27 {dimension_numbers = #tpu.dot_dimension_numbers<[1], [0], [0], [1], [0, 0, 1, 1], [], []>} : vector<128x4xbf16>, vector<4x16xbf16>, vector<128x16xf32> -> vector<128x16xf32>
    %c0_28 = arith.constant 0 : index
    %c0_29 = arith.constant 0 : index
    %62 = vector.load %arg10[%c0_28, %c0_29] : memref<1x16xf32, #tpu.memory_space<vmem>>, vector<1x16xf32>
    %63 = vector.broadcast %62 : vector<1x16xf32> to vector<128x16xf32>
    %64 = arith.addf %61, %63 : vector<128x16xf32>
    %65 = vector.shape_cast %1 : vector<8x16x16xf32> to vector<128x16xf32>
    %66 = arith.addf %64, %65 : vector<128x16xf32>
    %cst_30 = arith.constant 0.000000e+00 : f32
    %67 = vector.broadcast %cst_30 : f32 to vector<128x16xf32>
    %68 = arith.maximumf %66, %67 : vector<128x16xf32>
    %69 = vector.shape_cast %68 : vector<128x16xf32> to vector<1x8x16x16xf32>
    %c0_31 = arith.constant 0 : index
    %c0_32 = arith.constant 0 : index
    %c0_33 = arith.constant 0 : index
    %c0_34 = arith.constant 0 : index
    %70 = vector.load %arg11[%c0_31, %c0_32, %c0_33, %c0_34] : memref<1x8x16x16xf32, #tpu.memory_space<vmem>>, vector<1x8x16x16xf32>
    tpu.vector_store %arg11[%c0_31, %c0_32, %c0_33, %c0_34], %69 {strides = array<i32>} : memref<1x8x16x16xf32, #tpu.memory_space<vmem>>, vector<1x8x16x16xf32>,
    return
  }
  func.func @transform_0(%arg0: i32, %arg1: i32) -> (i32, i32, i32, i32) {
    %c0_i32 = arith.constant 0 : i32
    %c0_i32_0 = arith.constant 0 : i32
    %c0_i32_1 = arith.constant 0 : i32
    return %arg0, %arg1, %c0_i32, %c0_i32_0 : i32, i32, i32, i32
  }
  func.func @transform_1(%arg0: i32, %arg1: i32) -> (i32, i32, i32, i32) {
    %c8_i32 = arith.constant 8 : i32
    %0 = arith.muli %arg1, %c8_i32 : i32
    %c1_i32 = arith.constant 1 : i32
    %1 = arith.subi %0, %c1_i32 : i32
    %c0_i32 = arith.constant 0 : i32
    %2 = arith.maxsi %1, %c0_i32 : i32
    %c0_i32_0 = arith.constant 0 : i32
    %c0_i32_1 = arith.constant 0 : i32
    %c0_i32_2 = arith.constant 0 : i32
    return %arg0, %2, %c0_i32_0, %c0_i32_1 : i32, i32, i32, i32
  }
  func.func @transform_2(%arg0: i32, %arg1: i32) -> (i32, i32, i32, i32) {
    %c8_i32 = arith.constant 8 : i32
    %0 = arith.muli %arg1, %c8_i32 : i32
    %c8_i32_0 = arith.constant 8 : i32
    %1 = arith.addi %0, %c8_i32_0 : i32
    %c15_i32 = arith.constant 15 : i32
    %2 = arith.minsi %1, %c15_i32 : i32
    %c0_i32 = arith.constant 0 : i32
    %c0_i32_1 = arith.constant 0 : i32
    %c0_i32_2 = arith.constant 0 : i32
    return %arg0, %2, %c0_i32, %c0_i32_1 : i32, i32, i32, i32
  }
  func.func @transform_3(%arg0: i32, %arg1: i32) -> (i32, i32) {
    %c0_i32 = arith.constant 0 : i32
    %c0_i32_0 = arith.constant 0 : i32
    %c0_i32_1 = arith.constant 0 : i32
    return %c0_i32, %c0_i32_0 : i32, i32
  }
  func.func @transform_4(%arg0: i32, %arg1: i32) -> (i32, i32) {
    %c0_i32 = arith.constant 0 : i32
    %c0_i32_0 = arith.constant 0 : i32
    %c0_i32_1 = arith.constant 0 : i32
    return %c0_i32, %c0_i32_0 : i32, i32
  }
  func.func @transform_5(%arg0: i32, %arg1: i32) -> (i32, i32) {
    %c0_i32 = arith.constant 0 : i32
    %c0_i32_0 = arith.constant 0 : i32
    %c0_i32_1 = arith.constant 0 : i32
    return %c0_i32, %c0_i32_0 : i32, i32
  }
  func.func @transform_6(%arg0: i32, %arg1: i32) -> (i32, i32) {
    %c0_i32 = arith.constant 0 : i32
    %c0_i32_0 = arith.constant 0 : i32
    %c0_i32_1 = arith.constant 0 : i32
    return %c0_i32, %c0_i32_0 : i32, i32
  }
  func.func @transform_7(%arg0: i32, %arg1: i32) -> (i32, i32) {
    %c0_i32 = arith.constant 0 : i32
    %c0_i32_0 = arith.constant 0 : i32
    %c0_i32_1 = arith.constant 0 : i32
    return %c0_i32, %c0_i32_0 : i32, i32
  }
  func.func @transform_8(%arg0: i32, %arg1: i32) -> (i32, i32) {
    %c0_i32 = arith.constant 0 : i32
    %c0_i32_0 = arith.constant 0 : i32
    %c0_i32_1 = arith.constant 0 : i32
    return %c0_i32, %c0_i32_0 : i32, i32
  }
  func.func @transform_9(%arg0: i32, %arg1: i32) -> (i32, i32, i32, i32) {
    %c0_i32 = arith.constant 0 : i32
    %c0_i32_0 = arith.constant 0 : i32
    %c0_i32_1 = arith.constant 0 : i32
    return %arg0, %arg1, %c0_i32, %c0_i32_0 : i32, i32, i32, i32
  }
}

</mosaic_0001>

<bundles_post_ra>
// kernel: tpu_custom_call.1
= control target key start
LH: loop header
LB: loop body
LE: loop exit
PB: predicated region body
PF: predicated region fallthrough
CT: control target
= control target key end

     0   :  { %s3295_s0 = inlined_call_operand.hbm [shape: f32[2,16,16,16], index: 0, kind: input, shape index: {}]   ;;  %s3296_s1 = inlined_call_operand.hbm [shape: f32[2,16,16,16], index: 1, kind: input, shape index: {}]   ;;  %s3297_s2 = inlined_call_operand.hbm [shape: f32[2,16,16,16], index: 2, kind: input, shape index: {}]   ;;  %s3298_s3 = inlined_call_operand.vmem [shape: bf16[16,4], index: 3, kind: input, shape index: {}]   ;;  %s3299_s4 = inlined_call_operand.vmem [shape: f32[1,4], index: 4, kind: input, shape index: {}]   ;;  %s3300_s5 = inlined_call_operand.vmem [shape: bf16[36,4], index: 5, kind: input, shape index: {}]   ;;  %s3301_s6 = inlined_call_operand.vmem [shape: f32[1,4], index: 6, kind: input, shape index: {}]   ;;  %s3302_s7 = inlined_call_operand.vmem [shape: bf16[4,16], index: 7, kind: input, shape index: {}]   ;;  %s3303_s8 = inlined_call_operand.vmem [shape: f32[1,16], index: 8, kind: input, shape index: {}]   ;;  %s3304_s9 = inlined_call_operand.hbm [shape: f32[2,16,16,16], index: 9, kind: output, shape index: {}]  }
   0x1   :  { %3327 = sst [smem:[#allocation26_spill]] %s3295_s0 }
   0x2   :  { %3328 = sst [smem:[#allocation27_spill]] %s3296_s1 }
   0x3   :  { %3329 = sst [smem:[#allocation28_spill]] %s3297_s2 }
   0x4   :  { %3330 = sst [smem:[#allocation29_spill]] %s3298_s3 }
   0x5   :  { %3331 = sst [smem:[#allocation30_spill]] %s3299_s4 }
   0x6   :  { %3332 = sst [smem:[#allocation31_spill]] %s3300_s5 }
   0x7   :  { %3333 = sst [smem:[#allocation32_spill]] %s3301_s6 }
   0x8   :  { %3334 = sst [smem:[#allocation33_spill]] %s3302_s7 }
   0x9   :  { %3335 = sst [smem:[#allocation34_spill]] %s3303_s8 }
   0xa   :  { %3336 = sst [smem:[#allocation35_spill]] %s3304_s9 }
   0xb   :  { %14 = vsyncpa [#allocation3], 0 }
   0xc   :  { %16 = vsyncpa [#allocation3 + $0x1], 0 }
   0xd   :  { %17 = vsyncpa [#allocation6], 0 }
   0xe   :  { %19 = vsyncpa [#allocation6 + $0x1], 0 }
   0xf   :  { %20 = vsyncpa [#allocation4], 0 }
  0x10   :  { %22 = vsyncpa [#allocation4 + $0x1], 0  ;;  %s2348_s30 = smov 0   ;;  %s2350_s10 = smov 0  }
  0x11   :  { %s2352_s11 = smov 0   ;;  %s2354_s12 = smov 0  }
  0x12   :  { %s2356_s13 = smov 0   ;;  %s2358_s14 = smov 0  }
  0x13   :  { %s2360_s15 = smov 0   ;;  %s2362_s16 = smov 0  }
  0x14   :  { %s2364_s17 = smov 0   ;;  %s2366_s18 = smov 0  }
  0x15   :  { %s2368_s19 = smov 0   ;;  %s2370_s20 = smov 0  }
  0x16   :  { %s2372_s21 = smov 0   ;;  %s2374_s22 = smov 0  }
  0x17 LB: > { %3337 = sst [smem:[#allocation13_spill]] %s2245_s13  ;;  %s2419_s23 = sadd.s32 4294967295, %s2281_s22   ;;  %s2281_s22 = sphi %s2374_s22, %s28_s22   ;;  %s2277_s21 = sphi %s2372_s21, %s3403_s21   ;;  %s2273_s20 = sphi %s2370_s20, %s3402_s20   ;;  %s2269_s19 = sphi %s2368_s19, %s3401_s19   ;;  %s2265_s18 = sphi %s2366_s18, %s3400_s18   ;;  %s2261_s17 = sphi %s2364_s17, %s3399_s17   ;;  %s2257_s16 = sphi %s2362_s16, %s3408_s16   ;;  %s2253_s15 = sphi %s2360_s15, %s3407_s15   ;;  %s2249_s14 = sphi %s2358_s14, %s3397_s14   ;;  %s2245_s13 = sphi %s2356_s13, %s3396_s13   ;;  %s2241_s12 = sphi %s2354_s12, %s3395_s12   ;;  %s2237_s11 = sphi %s2352_s11, %s3406_s11   ;;  %s2233_s10 = sphi %s2350_s10, %s3405_s10   ;;  %s2229_s30 = sphi %s2348_s30, %s3404_s30  }
  0x18   : > { %3338 = sst [smem:[#allocation14_spill]] %s2249_s14  ;;  %s37_s24 = sadd.s32 1, %s2273_s20 }
  0x19   : > { %3339 = sst [smem:[#allocation15_spill]] %s2261_s17  ;;  %p38_p0 = scmp.ge.s32.totalorder %s37_s24, 2 }
  0x1a   : > { %3340 = sst [smem:[#allocation16_spill]] %s2265_s18  ;;  %s40_s25 = sadd.s32 1, %s2277_s21 }
  0x1b   : > { %3341 = sst [smem:[#allocation17_spill]] %s2269_s19  ;;  %p3323_p1 = scmp.eq.s32.totalorder %s2281_s22, 0 }
  0x1c   : > { %3342 = sst [smem:[#allocation18_spill]] %s2273_s20  ;;  %p3315_p2 = scmp.eq.s32.totalorder %s2419_s23, 0 }
  0x1d   : > { %3343 = sst [smem:[#allocation19_spill]] %s2277_s21  ;;  %s3410_s24 = smov (%p38_p0, %s37_s24), 0 }
  0x1e   : > { %3344 = sst [smem:[#allocation20_spill]] %s3410_s24  ;;  %s3412_s25 = smov (!%p38_p0, %s40_s25), %s2277_s21 }
  0x1f   : > { %s45_s26 = ssub.s32 %s2273_s20, %s3410_s24  ;;  %s1710_s27 = sshll.u32 %s2273_s20, 3 }
  0x20   : > { %p42_p3 = scmp.ge.s32.totalorder %s3412_s25, 2  ;;  %s1711_s28 = sadd.s32 4294967295, %s1710_s27 }
  0x21   : > { %p74_p4 = scmp.gt.s32.totalorder %s1711_s28, 0  ;;  %s1712_s29 = sshll.u32 %s3410_s24, 3 }
  0x22   : > { %s3414_s25 = smov (%p42_p3, %s3412_s25), 0  ;;  %s1713_s19 = sadd.s32 4294967295, %s1712_s29 }
  0x23   : > { %3345 = sst [smem:[#allocation21_spill]] %s3414_s25  ;;  %s3416_s28 = smov (!%p74_p4, %s1711_s28), 0 }
  0x24   : > { %s2436_s9 = ssub.s32 %s2277_s21, %s3414_s25  ;;  %p78_p5 = scmp.gt.s32.totalorder %s1713_s19, 0 }
  0x25   : > { %3346 = sst [smem:[#allocation22_spill]] %s2436_s9  ;;  %s2439_s8 = sor.u32 %s45_s26, %s2436_s9 }
  0x26   : > { %p47_p6 = scmp.eq.s32.totalorder %s2439_s8, 0  ;;  %s85_s6 = sadd.s32 1, %s2249_s14 }
  0x27   : > { %s3418_s19 = smov (!%p78_p5, %s1713_s19), 0  ;;  %p92_p7 = scmp.ne.s32.totalorder %s2249_s14, %s2245_s13 }
  0x28   : > { %p98_p8 = scmp.ne.s32.totalorder %s2245_s13, %s2241_s12  ;;  %s81_s24 = ssub.s32 %s3416_s28, %s3418_s19 }
  0x29   : > { %s2447_s25 = sadd.s32 8, %s1710_s27  ;;  %s82_s7 = sor.u32 %s81_s24, %s2436_s9 }
  0x2a   : > { %p2452_p9 = por %p92_p7, %p3323_p1  ;;  %p83_p10 = scmp.eq.s32.totalorder %s82_s7, 0 }
  0x2b   : > { %p2458_p11 = por %p98_p8, %p3315_p2  ;;  %s2463_s12 = sadd.s32 8, %s1712_s29 }
  0x2c   : > { %s2466_s19 = scalar_select %p83_p10, %s2249_s14, %s85_s6  }
  0x2d   : > { %s3348_s5 = scalar_select %p2458_p11, 1, 0 }
  0x2e   : > { %3350 = sst [smem:[#allocation24_spill]] %s2466_s19  ;;  %p3314_p0 = scmp.lt.s32.totalorder %s2281_s22, 4 }
  0x2f   : > { %3349 = sst [smem:[#allocation23_spill]] %s3348_s5  ;;  %s2471_s24 = sshll.u32 %s2277_s21, 5 }
  0x30   : > { %s354_s7 = sand.u32 1, %s2281_s22   ;;  %s356_s27 = sand.u32 1, %s2249_s14  }
  0x31   : > { %s1723_s4 = sshll.u32 %s356_s27, 4  ;;  %s1726_s18 = sshll.u32 %s3416_s28, 1 }
  0x32   : > { %s368_s3 = sadd.s32 %s1726_s18, %s2471_s24  ;;  %s358_s5 = scalar_lea.vmem [#allocation5], %s1723_s4 }
  0x33   : > { %s371_s13 = sshll.u32 %s358_s5, 4  ;;  %s1728_s2 = sshll.u32 %s368_s3, 7  ;;  %s372_s13 = int_to_ptr.vmem [resolvable:$true] %s371_s13 }
  0x34   : > { %s3351_s1 = sld [smem:[#allocation27_spill]]  ;;  %p2483_p3 = pnand %p3314_p0, %p2452_p9 }
  0x35   : > { %p1734_p4 = scmp.ge.s32.totalorder %s2281_s22, 1  ;;  %p406_p5 = scmp.lt.s32.totalorder %s2281_s22, 5 }
  0x36   : > { %s2489_s27 = scalar_lea.sflag [#allocation6], %s354_s7  ;;  %p2047_p7 = pneg %p2483_p3 }
  0x37   : > { %s2058_s4 = scalar_lea.vmem %s372_s13, 256  ;;  %s2283_s3 = smov [#allocation5]  }
  0x38   : > { %p2059_p8 = scmp.ne.s32.totalorder %s372_s13, %s2058_s4  ;;  %s2063_s5 = sshll.u32 %s2283_s3, 4  ;;  %s2064_s5 = int_to_ptr.vmem [resolvable:$false] %s2063_s5 }
  0x39   : > { %p2066_p12 = scmp.lt.s32.totalorder %s372_s13, %s2064_s5 }
  0x3a   : > { %s370_s6 = scalar_lea.hbm %s3351_s1, %s1728_s2  ;;  %p2061_p10 = pnand %p2059_p8, %p2047_p7 }
  0x3b   : > { %s2065_s2 = scalar_lea.vmem %s2064_s5, 512 }
  0x3c   : > { %p2062_p13 = pneg %p2061_p10  ;;  %p2067_p9 = scmp.lt.s32.totalorder %s2065_s2, %s2058_s4 }
  0x3e   : > { %p2068_p0 = por %p2067_p9, %p2066_p12 }
  0x40   : > { %p2069_p2 = pnand %p2068_p0, %p2062_p13 }
  0x42   : > { %2072 = shalt.err (!%p2069_p2)
}
  0x43   : > { %s3316_s9 = smov 128   ;;  %s3318_s18 = smov 8  }
  0x44   : > { %1892 = dma.hbm_to_vmem [thread:$0]  (!%p2483_p3), %s370_s6, 256, %s372_s13, %s2489_s27, %s3316_s9, %s3316_s9, %s3318_s18  }
  0x45   : > { %p2503_p2 = pnand %p1734_p4, %p406_p5  ;;  %s1709_s26 = sadd.s32 4294967294, %s2281_s22  }
  0x46   : > { %s49_s7 = sadd.s32 1, %s2261_s17  ;;  %p56_p12 = scmp.ne.s32.totalorder %s2261_s17, %s2257_s16 }
  0x47   : > { %s2512_s29 = scalar_select %p47_p6, %s2261_s17, %s49_s7  }
  0x48   : > { %p62_p13 = scmp.ne.s32.totalorder %s2257_s16, %s2253_s15  ;;  %p286_p0 = scmp.eq.s32.totalorder %s2419_s23, 3 }
  0x49   : > { %3354 = sst [smem:[#allocation25_spill]] %s2512_s29  ;;  %p292_p7 = scmp.eq.s32.totalorder %s1709_s26, 3 }
  0x4a   : > { %p2521_p8 = por %p3323_p1, %p56_p12  ;;  %p3356_p3 = scmp.eq.s32.totalorder %s2419_s23, 0 }
  0x4b   : > { %p2531_p5 = por %p286_p0, %p56_p12  ;;  %p2535_p6 = por %p292_p7, %p62_p13 }
  0x4c   : > { %p2527_p4 = por %p3356_p3, %p62_p13  ;;  %s330_s4 = sand.u32 1, %s2261_s17  }
  0x4d   : > { %s3358_s8 = scalar_select %p2531_p5, 1, 0 }
  0x4e   : > { %s3359_s6 = scalar_select %p2535_p6, 1, 0 }
  0x4f   : > { %s1779_s3 = sshll.u32 %s2273_s20, 4  ;;  %s1718_s5 = sshll.u32 %s330_s4, 7 }
  0x50   : > { %s341_s2 = sadd.s32 %s1779_s3, %s2471_s24  ;;  %s334_s7 = scalar_lea.vmem [#allocation2], %s1718_s5 }
  0x51   : > { %s1722_s26 = sshll.u32 %s341_s2, 7  ;;  %s344_s9 = sshll.u32 %s334_s7, 4  ;;  %s345_s9 = int_to_ptr.vmem [resolvable:$true] %s344_s9 }
  0x52   : > { %s3360_s0 = sld [smem:[#allocation26_spill]]  ;;  %p3361_p10 = scmp.lt.s32.totalorder %s2281_s22, 4 }
  0x53   : > { %s331_s14 = scalar_lea.sflag [#allocation3], %s330_s4  ;;  %s2086_s20 = scalar_lea.vmem %s345_s9, 2048 }
  0x54   : > { %p2549_p9 = pnand %p3361_p10, %p2521_p8  ;;  %p2087_p13 = scmp.ne.s32.totalorder %s345_s9, %s2086_s20 }
  0x55   : > { %s2286_s3 = smov [#allocation2]  }
  0x56   : > { %p2075_p12 = pneg %p2549_p9  ;;  %s2091_s5 = sshll.u32 %s2286_s3, 4  ;;  %s2092_s5 = int_to_ptr.vmem [resolvable:$false] %s2091_s5 }
  0x57   : > { %s2093_s1 = scalar_lea.vmem %s2092_s5, 4096  ;;  %p2094_p3 = scmp.lt.s32.totalorder %s345_s9, %s2092_s5 }
  0x58   : > { %s343_s21 = scalar_lea.hbm %s3360_s0, %s1722_s26  ;;  %p2089_p0 = pnand %p2087_p13, %p2075_p12 }
  0x59   : > { %p2095_p1 = scmp.lt.s32.totalorder %s2093_s1, %s2086_s20 }
  0x5a   : > { %p2090_p7 = pneg %p2089_p0 }
  0x5b   : > { %p2096_p6 = por %p2095_p1, %p2094_p3 }
  0x5d   : > { %p2097_p5 = pnand %p2096_p6, %p2090_p7 }
  0x5f   : > { %2100 = shalt.err (!%p2097_p5)
}
  0x60   : > { %s3363_s18 = smov 8   ;;  %s3364_s13 = smov 128  }
  0x61   : > { %s3365_s4 = sld [smem:[#allocation22_spill]]  ;;  %p3366_p1 = scmp.lt.s32.totalorder %s2447_s25, 15 }
  0x62   : > { %1889 = dma.hbm_to_vmem [thread:$0]  (!%p2549_p9), %s343_s21, 2048, %s345_s9, %s331_s14, %s3364_s13, %s3364_s13, %s3363_s18  }
  0x63   : > { %s3420_s25 = smov (!%p3366_p1, %s2447_s25), 15  ;;  %p3367_p8 = scmp.lt.s32.totalorder %s2463_s12, 15 }
  0x64   : > { %s121_s20 = sadd.s32 1, %s2237_s11  ;;  %p128_p5 = scmp.ne.s32.totalorder %s2237_s11, %s2233_s10 }
  0x65   : > { %s3422_s12 = smov (!%p3367_p8, %s2463_s12), 15  ;;  %p134_p6 = scmp.ne.s32.totalorder %s2233_s10, %s2229_s30 }
  0x66   : > { %s117_s29 = ssub.s32 %s3420_s25, %s3422_s12  ;;  %p3368_p10 = scmp.eq.s32.totalorder %s2281_s22, 0 }
  0x67   : > { %s118_s2 = sor.u32 %s117_s29, %s3365_s4  ;;  %p3370_p0 = scmp.eq.s32.totalorder %s2419_s23, 0 }
  0x68   : > { %p2574_p12 = por %p128_p5, %p3368_p10  ;;  %p119_p13 = scmp.eq.s32.totalorder %s118_s2, 0 }
  0x69   : > { %p2580_p7 = por %p134_p6, %p3370_p0  ;;  %s383_s21 = sand.u32 1, %s2237_s11  }
  0x6a   : > { %s1731_s9 = sshll.u32 %s3420_s25, 1  ;;  %s1729_s12 = sshll.u32 %s383_s21, 4 }
  0x6b   : > { %s3371_s14 = scalar_select %p2580_p7, 1, 0 }
  0x6c   : > { %s2586_s7 = scalar_select %p119_p13, %s2237_s11, %s121_s20  }
  0x6d   : > { %s395_s3 = sadd.s32 %s1731_s9, %s2471_s24  ;;  %s3372_s4 = sld [smem:[#allocation28_spill]] }
  0x6e   : > { %s1733_s30 = sshll.u32 %s395_s3, 7  ;;  %s385_s0 = scalar_lea.vmem [#allocation7], %s1729_s12 }
  0x6f   : > { %s398_s17 = sshll.u32 %s385_s0, 4  ;;  %p3373_p9 = scmp.lt.s32.totalorder %s2281_s22, 4  ;;  %s399_s17 = int_to_ptr.vmem [resolvable:$true] %s398_s17 }
  0x70   : > { %s2114_s25 = scalar_lea.vmem %s399_s17, 256  ;;  %s2287_s24 = smov [#allocation7]  }
  0x71   : > { %p2596_p3 = pnand %p3373_p9, %p2574_p12  ;;  %p2115_p8 = scmp.ne.s32.totalorder %s399_s17, %s2114_s25 }
  0x72   : > { %s2119_s20 = sshll.u32 %s2287_s24, 4  ;;  %s2120_s20 = int_to_ptr.vmem [resolvable:$false] %s2119_s20 }
  0x73   : > { %s397_s29 = scalar_lea.hbm %s3372_s4, %s1733_s30  ;;  %p2103_p1 = pneg %p2596_p3 }
  0x74   : > { %s2121_s21 = scalar_lea.vmem %s2120_s20, 512  ;;  %p2122_p10 = scmp.lt.s32.totalorder %s399_s17, %s2120_s20 }
  0x75   : > { %p2117_p5 = pnand %p2115_p8, %p2103_p1  ;;  %p2123_p13 = scmp.lt.s32.totalorder %s2121_s21, %s2114_s25 }
  0x77   : > { %p2118_p6 = pneg %p2117_p5  ;;  %p2124_p0 = por %p2123_p13, %p2122_p10 }
  0x79   : > { %p2125_p7 = pnand %p2124_p0, %p2118_p6 }
  0x7b   : > { %2128 = shalt.err (!%p2125_p7)
}
  0x7c   : > { %1895 = dma.hbm_to_vmem [thread:$0]  (!%p2596_p3), %s397_s29, 256, %s399_s17, %s2489_s27, %s3364_s13, %s3364_s13, %s3363_s18  }
  0x7d   : > { %410 = sbr.rel (%p2503_p2) target bundleno = 1025 (0x401), region = 56  ;;  %s2611_s0 = sand.u32 (!%p2503_p2), 1, %s2257_s16  }
  0x7e   : > { %s1735_s26 = sshll.u32 (!%p2503_p2), %s2611_s0, 7  ;;  %s413_s9 = scalar_lea.sflag (!%p2503_p2), [#allocation3], %s2611_s0 }
  0x7f   : > { %s2617_s12 = scalar_lea.vmem (!%p2503_p2), [#allocation2], %s1735_s26 }
  0x82   : > { %2212 = dma.done.wait (%p2527_p4), %s413_s9, 2048  }
  0x83   : > { %2214 = vsyncadd (%p2527_p4), %s413_s9, 4294965248  ;;  %s3375_s17 = sld [smem:[#allocation13_spill]]  ;;  %s421_s28 = sand.u32 1, %s2419_s23  }
  0x84   : > { %s422_s3 = scalar_lea.sflag [#allocation6], %s421_s28 }
  0x89   : > { %s423_s18 = sand.u32 1, %s3375_s17  }
  0x8a   : > { %s1736_s13 = sshll.u32 %s423_s18, 4 }
  0x8b   : > { %s425_s30 = scalar_lea.vmem [#allocation5], %s1736_s13 }
  0x8c   : > { %2216 = dma.done.wait (%p2458_p11), %s422_s3, 256  }
  0x8d   : > { %2218 = vsyncadd (%p2458_p11), %s422_s3, 4294967040  ;;  %s432_s5 = sand.u32 1, %s2233_s10   ;;  %p3377_p2 = scmp.ne.s32.totalorder %s3371_s14, 0 }
  0x8e   : > { %s2630_s1 = sshll.u32 %s432_s5, 4 }
  0x8f   : > { %s434_s19 = scalar_lea.vmem [#allocation7], %s2630_s1 }
  0x90   : > { %2220 = dma.done.wait (%p3377_p2), %s422_s3, 256  }
  0x91   : > { %2222 = vsyncadd (%p3377_p2), %s422_s3, 4294967040  ;;  %s3378_s29 = sld [smem:[#allocation29_spill]]  ;;  %v506_v1 = vld [vmem:[%s425_s30] sm:$0xff]  ;;  %v507_v2 = vld [vmem:[%s425_s30 + $0x8] sm:$0xff]  ;;  %vm535_vm0 = vcmask 130048   ;;  %s2288_s21 = smov 4  }
  0x92   : > { %v500_v3 = vld [vmem:[%s2617_s12 + $0x50] sm:$0xff]  ;;  %v510_v4 = vpack.c.bf16 %v507_v2, %v506_v1  ;;  %v501_v5 = vld [vmem:[%s2617_s12 + $0x58] sm:$0xff]  ;;  %v490_v6 = vld [vmem:[%s2617_s12] sm:$0xff]  ;;  %s3379_s14 = sld [smem:[#allocation16_spill]]  ;;  %s2289_s17 = smov 28   ;;  %vm751_vm2 = vcmask 1040384  }
  0x93   : > { %v491_v7 = vld [vmem:[%s2617_s12 + $0x8] sm:$0xff]  ;;  %v516_v8 = vpack.c.bf16 %v501_v5, %v500_v3  ;;  %v502_v10 = vld [vmem:[%s2617_s12 + $0x60] sm:$0xff]  ;;  %v492_v12 = vld [vmem:[%s2617_s12 + $0x10] sm:$0xff]  ;;  %s3380_s24 = sld [smem:[#allocation30_spill]]  ;;  %s2290_s27 = smov 16   ;;  %vm812_vm3 = vcmask 1046528  }
  0x94   : > { %v511_v9 = vpack.c.bf16 %v491_v7, %v490_v6  ;;  %v503_v11 = vld [vmem:[%s2617_s12 + $0x68] sm:$0xff]  ;;  %1814 = vmatprep.mubr.msk.bf16.mxu0 %vm535_vm0, %v510_v4  ;;  %v493_v14 = vld [vmem:[%s2617_s12 + $0x18] sm:$0xff]  ;;  %v494_v16 = vld [vmem:[%s2617_s12 + $0x20] sm:$0xff]  ;;  %s2291_s28 = smov 8   ;;  %s2292_s18 = smov 12   ;;  %vm1247_vm5 = vcmask 1041408  }
  0x95   : > { %v517_v13 = vpack.c.bf16 %v503_v11, %v502_v10  ;;  %1826 = vmatprep.mubr.msk.bf16.mxu1 %vm535_vm0, %v516_v8  ;;  %v512_v15 = vpack.c.bf16 %v493_v14, %v492_v12  ;;  %v504_v17 = vld [vmem:[%s2617_s12 + $0x70] sm:$0xff]  ;;  %v505_v18 = vld [vmem:[%s2617_s12 + $0x78] sm:$0xff]  ;;  %v495_v19 = vld [vmem:[%s2617_s12 + $0x28] sm:$0xff]  ;;  %s2293_s13 = smov 24   ;;  %s2294_s3 = smov 20   ;;  %vm1060_vm6 = vcmask 31744  }
  0x96   : > { %v518_v20 = vpack.c.bf16 %v505_v18, %v504_v17  ;;  %v508_v21 = vld [vmem:[%s434_s19] sm:$0xff]  ;;  %v509_v22 = vld [vmem:[%s434_s19 + $0x8] sm:$0xff]  ;;  %v513_v25 = vpack.c.bf16 %v495_v19, %v494_v16  ;;  %s2295_s30 = smov 32   ;;  %s3385_s19 = sld [smem:[#allocation31_spill]]  ;;  %vm1085_vm7 = vcmask 64512   ;;  %vm1102_vm8 = vcmask 97280  }
  0x97   : > { %v2025_v0 = vld [vmem:[%s3378_s29] sm:$0xff]   ;;  %v496_v23 = vld [vmem:[%s2617_s12 + $0x30] sm:$0xff]  ;;  %v497_v24 = vld [vmem:[%s2617_s12 + $0x38] sm:$0xff]  ;;  %v519_v26 = vpack.c.bf16 %v509_v22, %v508_v21  ;;  %vm1135_vm9 = vcmask 162816   ;;  %vm1152_vm10 = vcmask 195584   ;;  %vm1169_vm11 = vcmask 228352  }
  0x98   : > { %1812 = vmatprep.subr.bf16.mxu0 %v2025_v0  ;;  %1874 = vmatprep.subr.bf16.mxu1 %v2025_v0  ;;  %v514_v27 = vpack.c.bf16 %v497_v24, %v496_v23  ;;  %v498_v28 = vld [vmem:[%s2617_s12 + $0x40] sm:$0xff]  ;;  %v499_v29 = vld [vmem:[%s2617_s12 + $0x48] sm:$0xff]  ;;  %p699_p11 = scmp.eq.s32.totalorder %s3379_s14, 0  ;;  %p703_p4 = scmp.eq.s32.totalorder %s3379_s14, 1  ;;  %vm1186_vm12 = vcmask 261120   ;;  %vm1230_vm13 = vcmask 293888  }
  0x99   : > { %1813 = vmatpush3.bf16.msra.mxu0 %v2025_v0  ;;  %1875 = vmatpush3.bf16.msra.mxu1 %v2025_v0  ;;  %v515_v30 = vpack.c.bf16 %v499_v29, %v498_v28  ;;  %v2673_v33 = vld [vmem:[%s3380_s24] ss:$0 sm:$0xff]  ;;  %s1780_s5 = sshll.u32 %s3379_s14, 4  ;;  %s3391_s25 = sld [smem:[#allocation35_spill]] }
  0x9a   : > { %s700_s20 = scalar_select %p699_p11, 1, 0 }
  0x9b   : > { %s704_s9 = scalar_select %p703_p4, 1, 0 }
  0x9c   : > { %1815 = vmatmul.mubr.msk.bf16.vlgmr.msra.gmra.mxu0 %vm535_vm0, %v511_v9  ;;  %1827 = vmatmul.mubr.msk.bf16.vlgmr.msra.gmra.mxu1 %vm535_vm0, %v517_v13  ;;  %v701_v57 = vstv %s700_s20  ;;  %s3386_s23 = smov %s3385_s19  ;;  %s1553_s20 = scalar_lea.sflag [#allocation4], %s2611_s0 }
  0x9d   : > { %1818 = vmatprep.mubr.msk.bf16.mxu0 %vm535_vm0, %v512_v15  ;;  %1830 = vmatprep.mubr.msk.bf16.mxu1 %vm535_vm0, %v518_v20  ;;  %vm2709_vm1 = vcmp.eq.s32.totalorder %v701_v57, 1  ;;  %v705_v1 = vstv %s704_s9  ;;  %p3392_p7 = scmp.ne.s32.totalorder %s3358_s8, 0 }
  0x9e   : > { %vm2725_vm4 = vcmp.eq.s32.totalorder %v705_v1, 1 }
  0xa4   : > { %1819 = vmatmul.mubr.msk.bf16.gmra.mxu0 %vm535_vm0, %v513_v25  ;;  %1831 = vmatmul.mubr.msk.bf16.gmra.mxu1 %vm535_vm0, %v519_v26 }
  0xa5   : > { %1822 = vmatprep.mubr.msk.bf16.mxu0 %vm535_vm0, %v514_v27 }
  0xac   : > { %1823 = vmatmul.mubr.msk.bf16.gmra.mxu0 %vm535_vm0, %v515_v30 }
 0x15c   : > { %v1816_v31 = vpop.f32.mrf.mxu0  ;;  %v1828_v32 = vpop.f32.mrf.mxu1 }
 0x15d   : > { %v609_v36 = vadd.f32 %v1816_v31, %v2673_v33  ;;  %v657_v39 = vadd.f32 %v1828_v32, %v2673_v33 }
 0x15e   : > { %v600_v34 = vpop.f32.mrf.mxu0  ;;  %v648_v35 = vpop.f32.mrf.mxu1 }
 0x15f   : > { %v2680_v43 = vmax.f32 %v609_v36, 0.0  ;;  %v2687_v47 = vmax.f32 %v657_v39, 0.0  ;;  %v601_v52 = vadd.f32 %v2673_v33, %v600_v34  ;;  %v649_v58 = vadd.f32 %v2673_v33, %v648_v35 }
 0x160   : > { %v1817_v37 = vpop.f32.mrf.mxu0  ;;  %v1829_v38 = vpop.f32.mrf.mxu1 }
 0x161   : > { %v612_v40 = vadd.f32 %v1817_v37, %v2673_v33  ;;  %v660_v41 = vadd.f32 %v1829_v38, %v2673_v33  ;;  %v679_v60 = vmax.f32 %v601_v52, 0.0  ;;  %v755_v2 = vrot.slane %v2680_v43, 7 }
 0x162   : > { %v603_v42 = vpop.f32.mrf.mxu0  ;;  %v651_v45 = vpop.f32.mrf.mxu1  ;;  %v773_v3 = vrot.slane %v2687_v47, 7  ;;  %v2716_v4 = vmax.f32 %v649_v58, 0.0  ;;  %v816_v10 = vrot.slane %v2680_v43, 1  ;;  %v834_v14 = vrot.slane %v2687_v47, 1 }
 0x163   : > { %v2682_v44 = vmax.f32 %v612_v40, 0.0  ;;  %v2689_v48 = vmax.f32 %v660_v41, 0.0  ;;  %v652_v53 = vadd.f32 %v2673_v33, %v651_v45  ;;  %v604_v55 = vadd.f32 %v2673_v33, %v603_v42 }
 0x164   : > { %v2684_v46 = vpop.f32.mrf.mxu0  ;;  %v1832_v51 = vpop.f32.mrf.mxu1  ;;  %v2721_v7 = vsel %vm2709_vm1, 0.0, %v679_v60  ;;  %v809_v16 = vsel %vm751_vm2, 0.0, %v773_v3  ;;  %v803_v17 = vsel %vm751_vm2, 0.0, %v755_v2  ;;  %v770_v20 = vrot.slane %v2716_v4, 7 }
 0x165   : > { %v884_v49 = vpack.c.bf16 %v2682_v44, %v2680_v43  ;;  %v890_v54 = vpack.c.bf16 %v2689_v48, %v2687_v47  ;;  %v2705_v61 = vmax.f32 %v652_v53, 0.0  ;;  %v680_v0 = vmax.f32 %v604_v55, 0.0 }
 0x166   : > { %v2693_v50 = vpop.f32.mrf.mxu0  ;;  %v664_v59 = vpop.f32.mrf.mxu1  ;;  %v817_v11 = vrot.slane %v2682_v44, 1  ;;  %v774_v12 = vrot.slane %v2689_v48, 7  ;;  %v756_v15 = vrot.slane %v2682_v44, 7  ;;  %v752_v19 = vrot.slane %v2721_v7, 7 }
 0x167   : > { %913 = vrot.lane.b32.xlu0 %v884_v49, %s2288_s21  ;;  %1037 = vrot.lane.b32.xlu1 %v890_v54, %s2289_s17  ;;  %v889_v8 = vpack.c.bf16 %v2705_v61, %v2716_v4  ;;  %v2734_v13 = vsel %vm2709_vm1, 0.0, %v680_v0  ;;  %v831_v21 = vrot.slane %v2716_v4, 1  ;;  %v673_v22 = vadd.f32 %v1832_v51, %v2673_v33 }
 0x168   : > { %v2701_v56 = vpop.f32.mrf.mxu0  ;;  %v1833_v6 = vpop.f32.mrf.mxu1  ;;  %v835_v24 = vrot.slane %v2689_v48, 1  ;;  %v753_v25 = vrot.slane %v2734_v13, 7  ;;  %v771_v26 = vrot.slane %v2705_v61, 7  ;;  %v818_v28 = vsel %vm812_vm3, %v816_v10, %v817_v11 }
 0x169   : > { %v676_v27 = vadd.f32 %v1833_v6, %v2673_v33  ;;  %v864_v29 = vsel %vm812_vm3, %v817_v11, 0.0  ;;  %v883_v30 = vpack.c.bf16 %v2734_v13, %v2721_v7  ;;  %v775_v31 = vsel %vm751_vm2, %v773_v3, %v774_v12 }
 0x16a   : > { %v2707_v62 = vpop.f32.mrf.mxu0  ;;  %v667_v23 = vpop.f32.mrf.mxu1  ;;  %v757_v32 = vsel %vm751_vm2, %v755_v2, %v756_v15  ;;  %v697_v34 = vmax.f32 %v673_v22, 0.0  ;;  %v665_v35 = vadd.f32 %v2673_v33, %v664_v59  ;;  %v814_v42 = vrot.slane %v2734_v13, 1 }
 0x16b   : > { %976 = vrot.lane.b32.xlu0 %v884_v49, %s2290_s27  ;;  %925 = vrot.lane.b32.xlu1 %v890_v54, %s2288_s21  ;;  %v668_v36 = vadd.f32 %v2673_v33, %v667_v23  ;;  %v698_v38 = vmax.f32 %v676_v27, 0.0  ;;  %v894_v43 = vpack.c.bf16 %v864_v29, %v818_v28  ;;  %v2764_v44 = vpack.c.bf16 %v775_v31, %v809_v16 }
 0x16c   : > { %v1824_v5 = vpop.f32.mrf.mxu0  ;;  %v836_v45 = vsel %vm812_vm3, %v834_v14, %v835_v24  ;;  %v2768_v47 = vpack.c.bf16 %v757_v32, %v803_v17  ;;  %v870_v48 = vsel %vm812_vm3, %v835_v24, 0.0  ;;  %v772_v52 = vsel %vm751_vm2, %v770_v20, %v771_v26 }
 0x16d   : > { %v641_v39 = vadd.f32 %v1824_v5, %v2673_v33  ;;  %v2777_v53 = vmax.f32 %v665_v35, 0.0  ;;  %v808_v58 = vsel %vm751_vm2, 0.0, %v770_v20  ;;  %v2786_v59 = vsel %vm2725_vm4, 0.0, %v697_v34 }
 0x16e   : > { %v632_v18 = vpop.f32.mrf.mxu0  ;;  %v2790_v60 = vsel %vm2725_vm4, 0.0, %v698_v38  ;;  %v832_v5 = vrot.slane %v2705_v61, 1  ;;  %v2800_v6 = vpack.c.bf16 %v870_v48, %v836_v45  ;;  %v779_v10 = vrot.slane %v2786_v59, 7 }
 0x16f   : > { %988 = vrot.lane.b32.xlu0 %v890_v54, %s2290_s27  ;;  %986 = vrot.lane.b32.xlu1 %v889_v8, %s2290_s27  ;;  %v633_v40 = vadd.f32 %v2673_v33, %v632_v18  ;;  %v2771_v49 = vmax.f32 %v641_v39, 0.0  ;;  %v2779_v54 = vmax.f32 %v668_v36, 0.0  ;;  %v840_v11 = vrot.slane %v2786_v59, 1 }
 0x170   : > { %v1825_v37 = vpop.f32.mrf.mxu0  ;;  %v837_v61 = vrot.slane %v2777_v53, 1  ;;  %v780_v14 = vrot.slane %v2790_v60, 7  ;;  %v841_v24 = vrot.slane %v2790_v60, 1  ;;  %v833_v29 = vsel %vm812_vm3, %v831_v21, %v832_v5 }
 0x171   : > { %v644_v41 = vadd.f32 %v1825_v37, %v2673_v33  ;;  %v2773_v51 = vmax.f32 %v633_v40, 0.0  ;;  %v828_v63 = vrot.slane %v2771_v49, 1  ;;  %v767_v0 = vrot.slane %v2771_v49, 7 }
 0x172   : > { %v635_v57 = vpop.f32.mrf.mxu0  ;;  %v838_v12 = vrot.slane %v2779_v54, 1  ;;  %v2845_v4 = vsel %vm751_vm2, %v779_v10, %v780_v14  ;;  %v2848_v21 = vsel %vm751_vm2, 0.0, %v779_v10  ;;  %v869_v40 = vsel %vm812_vm3, %v832_v5, 0.0 }
 0x173   : > { %1035 = vrot.lane.b32.xlu0 %v889_v8, %s2289_s17  ;;  %923 = vrot.lane.b32.xlu1 %v889_v8, %s2288_s21  ;;  %v2781_v55 = vmax.f32 %v644_v41, 0.0  ;;  %v764_v1 = vrot.slane %v2773_v51, 7  ;;  %v2802_v8 = vpack.c.bf16 %v772_v52, %v808_v58  ;;  %v636_v9 = vadd.f32 %v2673_v33, %v635_v57 }
 0x174   : > { %v825_v15 = vrot.slane %v2773_v51, 1  ;;  %v807_v22 = vsel %vm751_vm2, 0.0, %v767_v0  ;;  %v839_v31 = vsel %vm812_vm3, %v837_v61, %v838_v12  ;;  %v871_v32 = vsel %vm812_vm3, %v838_v12, 0.0 }
 0x175   : > { %v768_v2 = vrot.slane %v2781_v55, 7  ;;  %v829_v3 = vrot.slane %v2781_v55, 1  ;;  %v2813_v16 = vmax.f32 %v636_v9, 0.0  ;;  %v806_v23 = vsel %vm751_vm2, 0.0, %v764_v1 }
 0x176   : > { %v2838_v37 = vpack.c.bf16 %v871_v32, %v839_v31  ;;  %v882_v41 = vpack.c.bf16 %v2845_v4, %v2848_v21  ;;  %v2859_v45 = vsel %vm812_vm3, %v841_v24, 0.0  ;;  %v2870_v52 = vsel %vm751_vm2, %v752_v19, %v753_v25 }
 0x177   : > { %911 = vrot.lane.b32.xlu0 %v883_v30, %s2288_s21  ;;  %937 = vrot.lane.b32.xlu1 %v894_v43, %s2291_s28  ;;  %v830_v17 = vsel %vm812_vm3, %v828_v63, %v829_v3  ;;  %v868_v18 = vsel %vm812_vm3, %v829_v3, 0.0  ;;  %v769_v20 = vsel %vm751_vm2, %v767_v0, %v768_v2  ;;  %v765_v26 = vrot.slane %v2813_v16, 7 }
 0x178   : > { %v826_v27 = vrot.slane %v2813_v16, 1  ;;  %v2824_v28 = vpack.c.bf16 %v868_v18, %v830_v17  ;;  %v2831_v30 = vpack.c.bf16 %v769_v20, %v807_v22  ;;  %v2875_v57 = vsel %vm751_vm2, 0.0, %v752_v19  ;;  %v2027_v20 = vld [vmem:[%s3386_s23 + $0x8] sm:$0xff]  }
 0x179   : > { %v766_v34 = vsel %vm751_vm2, %v764_v1, %v765_v26  ;;  %v813_v58 = vrot.slane %v2721_v7, 1  ;;  %v873_v63 = vpack.c.bf16 %v2870_v52, %v2875_v57  ;;  %v625_v0 = vadd.f32 %v2684_v46, %v2673_v33 }
 0x17a   : > { %v827_v35 = vsel %vm812_vm3, %v825_v15, %v826_v27  ;;  %v867_v36 = vsel %vm812_vm3, %v826_v27, 0.0  ;;  %v2840_v38 = vpack.c.bf16 %v766_v34, %v806_v23  ;;  %v628_v1 = vadd.f32 %v2701_v56, %v2673_v33  ;;  %v2028_v27 = vld [vmem:[%s3386_s23] sm:$0xff]  }
 0x17b   : > { %959 = vrot.lane.b32.xlu0 %v2768_v47, %s2292_s18  ;;  %1020 = vrot.lane.b32.xlu1 %v2764_v44, %s2293_s13  ;;  %v2842_v39 = vpack.c.bf16 %v867_v36, %v827_v35  ;;  %v899_v2 = vpack.c.bf16 %v869_v40, %v833_v29  ;;  %v815_v19 = vsel %vm812_vm3, %v813_v58, %v814_v42  ;;  %v863_v7 = vsel %vm812_vm3, %v814_v42, 0.0 }
 0x17c   : > { %v685_v25 = vmax.f32 %v625_v0, 0.0  ;;  %v686_v3 = vmax.f32 %v628_v1, 0.0  ;;  %v893_v46 = vpack.c.bf16 %v863_v7, %v815_v19  ;;  %v617_v56 = vadd.f32 %v2673_v33, %v2693_v50 }
 0x17d   : > { %v620_v5 = vadd.f32 %v2673_v33, %v2707_v62  ;;  %v2026_v33 = vld [vmem:[%s3385_s19 + $0x10] ss:$0 sps:$4 sm:$0x33]   ;;  %v776_v36 = vrot.slane %v2777_v53, 7  ;;  %v777_v40 = vrot.slane %v2779_v54, 7 }
 0x17e   : > { %v886_v9 = vpack.c.bf16 %v686_v3, %v685_v25  ;;  %v683_v13 = vmax.f32 %v617_v56, 0.0  ;;  %v822_v10 = vrot.slane %v685_v25, 1  ;;  %v761_v12 = vrot.slane %v685_v25, 7  ;;  %1876 = vmatprep.subr.msk.bf16.mxu1 %vm1247_vm5, %v2026_v33 }
 0x17f   : > { %993 = vrot.lane.b32.xlu0 %v894_v43, %s2294_s3  ;;  %949 = vrot.lane.b32.xlu1 %v2800_v6, %s2291_s28  ;;  %v2856_v43 = vsel %vm812_vm3, %v840_v11, %v841_v24  ;;  %v684_v42 = vmax.f32 %v620_v5, 0.0  ;;  %v823_v11 = vrot.slane %v686_v3, 1  ;;  %v762_v14 = vrot.slane %v686_v3, 7 }
 0x180   : > { %v902_v48 = vpack.c.bf16 %v2859_v45, %v2856_v43  ;;  %v1249_v50 = vsel %vm1247_vm5, %v2026_v33, 0  ;;  %v805_v18 = vsel %vm751_vm2, 0.0, %v761_v12  ;;  %v758_v24 = vrot.slane %v683_v13, 7 }
 0x181   : > { %v885_v61 = vpack.c.bf16 %v684_v42, %v683_v13  ;;  %v824_v62 = vsel %vm812_vm3, %v822_v10, %v823_v11  ;;  %v866_v15 = vsel %vm812_vm3, %v823_v11, 0.0  ;;  %1835 = vmatpush3.bf16.msra.mxu1 %v1249_v50  ;;  %v763_v17 = vsel %vm751_vm2, %v761_v12, %v762_v14 }
 0x182   : > { %v896_v22 = vpack.c.bf16 %v866_v15, %v824_v62  ;;  %1836 = vmatprep.subr.bf16.mxu1 %v2027_v20  ;;  %v2920_v23 = vpack.c.bf16 %v763_v17, %v805_v18  ;;  %v759_v26 = vrot.slane %v684_v42, 7  ;;  %v819_v29 = vrot.slane %v683_v13, 1 }
 0x183   : > { %1054 = vrot.lane.b32.xlu0 %v2800_v6, %s2295_s30  ;;  %969 = vrot.lane.b32.xlu1 %v2802_v8, %s2292_s18  ;;  %v820_v31 = vrot.slane %v684_v42, 1  ;;  %v804_v34 = vsel %vm751_vm2, 0.0, %v758_v24  ;;  %v810_v19 = vsel %vm751_vm2, 0.0, %v776_v36  ;;  %v888_v25 = vpack.c.bf16 %v2781_v55, %v2771_v49 }
 0x184   : > { %v760_v32 = vsel %vm751_vm2, %v758_v24, %v759_v26  ;;  %v887_v3 = vpack.c.bf16 %v2813_v16, %v2773_v51  ;;  %v891_v49 = vpack.c.bf16 %v2779_v54, %v2777_v53  ;;  %v892_v16 = vpack.c.bf16 %v2790_v60, %v2786_v59 }
 0x185   : > { %1837 = vmatpush3.bf16.msra.mxu1 %v2027_v20  ;;  %v2933_v35 = vpack.c.bf16 %v760_v32, %v804_v34  ;;  %v821_v58 = vsel %vm812_vm3, %v819_v29, %v820_v31  ;;  %v865_v0 = vsel %vm812_vm3, %v820_v31, 0.0 }
 0x186   : > { %1838 = vmatprep.subr.bf16.mxu1 %v2028_v27  ;;  %v895_v1 = vpack.c.bf16 %v865_v0, %v821_v58 }
 0x187   : > { %971 = vrot.lane.b32.xlu0 %v2764_v44, %s2292_s18  ;;  %1003 = vrot.lane.b32.xlu1 %v899_v2, %s2294_s3 }
 0x189   : > { %1839 = vmatpush3.bf16.msra.mxu1 %v2028_v27 }
 0x18b   : > { %1018 = vrot.lane.b32.xlu0 %v2802_v8, %s2293_s13  ;;  %935 = vrot.lane.b32.xlu1 %v893_v46, %s2291_s28 }
 0x18f   : > { %1052 = vrot.lane.b32.xlu0 %v899_v2, %s2295_s30  ;;  %1029 = vrot.lane.b32.xlu1 %v886_v9, %s2289_s17 }
 0x193   : > { %947 = vrot.lane.b32.xlu0 %v899_v2, %s2291_s28  ;;  %917 = vrot.lane.b32.xlu1 %v886_v9, %s2288_s21  ;;  %v778_v2 = vsel %vm751_vm2, %v776_v36, %v777_v40 }
 0x194   : > { %v881_v7 = vpack.c.bf16 %v778_v2, %v810_v19 }
 0x197   : > { %980 = vrot.lane.b32.xlu0 %v886_v9, %s2290_s27  ;;  %978 = vrot.lane.b32.xlu1 %v885_v61, %s2290_s27 }
 0x19b   : > { %1027 = vrot.lane.b32.xlu0 %v885_v61, %s2289_s17  ;;  %915 = vrot.lane.b32.xlu1 %v885_v61, %s2288_s21 }
 0x19f   : > { %1046 = vrot.lane.b32.xlu0 %v896_v22, %s2295_s30  ;;  %1012 = vrot.lane.b32.xlu1 %v2920_v23, %s2293_s13 }
 0x1a3   : > { %963 = vrot.lane.b32.xlu0 %v2920_v23, %s2292_s18  ;;  %941 = vrot.lane.b32.xlu1 %v896_v22, %s2291_s28 }
 0x1a7   : > { %997 = vrot.lane.b32.xlu0 %v896_v22, %s2294_s3  ;;  %961 = vrot.lane.b32.xlu1 %v2933_v35, %s2292_s18 }
 0x1ab   : > { %1010 = vrot.lane.b32.xlu0 %v2933_v35, %s2293_s13  ;;  %995 = vrot.lane.b32.xlu1 %v895_v1, %s2294_s3 }
 0x1af   : > { %1044 = vrot.lane.b32.xlu0 %v895_v1, %s2295_s30  ;;  %973 = vrot.lane.b32.xlu1 %v881_v7, %s2292_s18 }
 0x1b3   : > { %939 = vrot.lane.b32.xlu0 %v895_v1, %s2291_s28  ;;  %1033 = vrot.lane.b32.xlu1 %v888_v25, %s2289_s17 }
 0x1b7   : > { %984 = vrot.lane.b32.xlu0 %v888_v25, %s2290_s27  ;;  %921 = vrot.lane.b32.xlu1 %v888_v25, %s2288_s21 }
 0x1bb   : > { %1031 = vrot.lane.b32.xlu0 %v887_v3, %s2289_s17  ;;  %982 = vrot.lane.b32.xlu1 %v887_v3, %s2290_s27 }
 0x1bf   : > { %1050 = vrot.lane.b32.xlu0 %v2824_v28, %s2295_s30  ;;  %919 = vrot.lane.b32.xlu1 %v887_v3, %s2288_s21  ;;  %s3387_s21 = sld [smem:[#allocation33_spill]] }
 0x1c3   : > { %967 = vrot.lane.b32.xlu0 %v2831_v30, %s2292_s18  ;;  %1016 = vrot.lane.b32.xlu1 %v2831_v30, %s2293_s13 }
 0x1c7   : > { %1001 = vrot.lane.b32.xlu0 %v2824_v28, %s2294_s3  ;;  %945 = vrot.lane.b32.xlu1 %v2824_v28, %s2291_s28 }
 0x1cb   : > { %1014 = vrot.lane.b32.xlu0 %v2840_v38, %s2293_s13  ;;  %965 = vrot.lane.b32.xlu1 %v2840_v38, %s2292_s18 }
 0x1cf   : > { %1048 = vrot.lane.b32.xlu0 %v2842_v39, %s2295_s30  ;;  %999 = vrot.lane.b32.xlu1 %v2842_v39, %s2294_s3 }
 0x1d3   : > { %943 = vrot.lane.b32.xlu0 %v2842_v39, %s2291_s28  ;;  %990 = vrot.lane.b32.xlu1 %v891_v49, %s2290_s27  ;;  %s3388_s27 = sld [smem:[#allocation32_spill]] }
 0x1d7   : > { %1005 = vrot.lane.b32.xlu0 %v2800_v6, %s2294_s3  ;;  %1007 = vrot.lane.b32.xlu1 %v2838_v37, %s2294_s3  ;;  %s3389_s3 = sld [smem:[#allocation34_spill]] }
 0x1d9   : > { %v914_v51 = vpop.permute.xlu0 %913  ;;  %v2987_v55 = vpop.permute.xlu1 %1037 }
 0x1db   : > { %1022 = vrot.lane.b32.xlu0 %v881_v7, %s2293_s13  ;;  %1024 = vrot.lane.b32.xlu1 %v882_v41, %s2293_s13 }
 0x1dd   : > { %v977_v53 = vpop.permute.xlu0 %976  ;;  %v926_v54 = vpop.permute.xlu1 %925 }
 0x1de   : > { %v1084_v56 = vsel %vm1060_vm6, %v2764_v44, %v926_v54 }
 0x1df   : > { %1039 = vrot.lane.b32.xlu0 %v891_v49, %s2289_s17  ;;  %1041 = vrot.lane.b32.xlu1 %v892_v16, %s2289_s17 }
 0x1e1   : > { %v989_v6 = vpop.permute.xlu0 %988  ;;  %v2998_v28 = vpop.permute.xlu1 %986 }
 0x1e3   : > { %1056 = vrot.lane.b32.xlu0 %v2838_v37, %s2295_s30  ;;  %1058 = vrot.lane.b32.xlu1 %v902_v48, %s2295_s30  ;;  %s3148_s30 = scalar_lea.vmem [#allocation8], %s1735_s26  ;;  %s3390_s26 = sld [smem:[#allocation17_spill]] }
 0x1e4   : > { %s1569_s14 = sshll.u32 %s3148_s30, 4  ;;  %s3208_s14 = int_to_ptr.vmem [resolvable:$true] %s1569_s14 }
 0x1e5   : > { %v3006_v39 = vpop.permute.xlu0 %1035  ;;  %v924_v4 = vpop.permute.xlu1 %923 }
 0x1e6   : > { %v1081_v33 = vsel %vm1060_vm6, %v2802_v8, %v924_v4  ;;  %v1066_v8 = vsel %vm1060_vm6, %v2768_v47, %v914_v51 }
 0x1e9   : > { %v912_v21 = vpop.permute.xlu0 %911  ;;  %v938_v59 = vpop.permute.xlu1 %937  ;;  %s1775_s1 = sshll.u32 %s3390_s26, 5 }
 0x1ea   : > { %v1063_v44 = vsel %vm1060_vm6, %v873_v63, %v912_v21  ;;  %v1089_v31 = vsel %vm1085_vm7, %v1066_v8, %v938_v59  ;;  %s1566_s19 = sadd.s32 %s1780_s5, %s1775_s1 }
 0x1eb   : > { %s1776_s4 = sshll.u32 %s1566_s19, 7 }
 0x1ec   : > { %s3215_s24 = scalar_lea.hbm %s3391_s25, %s1776_s4 }
 0x1ed   : > { %v960_v60 = vpop.permute.xlu0 %959  ;;  %v3008_v41 = vpop.permute.xlu1 %1020 }
 0x1f1   : > { %v994_v46 = vpop.permute.xlu0 %993  ;;  %v950_v37 = vpop.permute.xlu1 %949 }
 0x1f2   : > { %v3013_v5 = vsel %vm1085_vm7, %v1084_v56, %v950_v37 }
 0x1f5   : > { %v3015_v43 = vpop.permute.xlu0 %1054  ;;  %v3017_v45 = vpop.permute.xlu1 %969 }
 0x1f9   : > { %v972_v48 = vpop.permute.xlu0 %971  ;;  %v3019_v9 = vpop.permute.xlu1 %1003 }
 0x1fd   : > { %v3021_v13 = vpop.permute.xlu0 %1018  ;;  %v936_v42 = vpop.permute.xlu1 %935 }
 0x1fe   : > { %v1087_v10 = vsel %vm1085_vm7, %v1063_v44, %v936_v42 }
 0x1ff   : > { %v1104_v11 = vsel %vm1102_vm8, %v1087_v10, %v960_v60 }
 0x200   : > { %v1120_v12 = vsel %vm535_vm0, %v1104_v11, %v977_v53 }
 0x201   : > { %v3029_v61 = vpop.permute.xlu0 %1052  ;;  %v1030_v14 = vpop.permute.xlu1 %1029  ;;  %v1137_v40 = vsel %vm1135_vm9, %v1120_v12, %v994_v46 }
 0x205   : > { %v948_v50 = vpop.permute.xlu0 %947  ;;  %v918_v15 = vpop.permute.xlu1 %917 }
 0x206   : > { %v1099_v62 = vsel %vm1085_vm7, %v1081_v33, %v948_v50  ;;  %v1072_v33 = vsel %vm1060_vm6, %v2920_v23, %v918_v15 }
 0x207   : > { %v1116_v52 = vsel %vm1102_vm8, %v1099_v62, %v972_v48 }
 0x208   : > { %v3037_v57 = vsel %vm535_vm0, %v1116_v52, %v989_v6 }
 0x209   : > { %v981_v63 = vpop.permute.xlu0 %980  ;;  %v979_v17 = vpop.permute.xlu1 %978 }
 0x20d   : > { %v1028_v18 = vpop.permute.xlu0 %1027  ;;  %v916_v20 = vpop.permute.xlu1 %915 }
 0x20e   : > { %v1069_v46 = vsel %vm1060_vm6, %v2933_v35, %v916_v20 }
 0x211   : > { %v1047_v22 = vpop.permute.xlu0 %1046  ;;  %v1013_v24 = vpop.permute.xlu1 %1012 }
 0x215   : > { %v964_v26 = vpop.permute.xlu0 %963  ;;  %v942_v27 = vpop.permute.xlu1 %941 }
 0x216   : > { %v1093_v62 = vsel %vm1085_vm7, %v1072_v33, %v942_v27 }
 0x219   : > { %v998_v29 = vpop.permute.xlu0 %997  ;;  %v962_v32 = vpop.permute.xlu1 %961 }
 0x21a   : > { %v1106_v34 = vsel %vm1102_vm8, %v1089_v31, %v962_v32 }
 0x21b   : > { %v1122_v0 = vsel %vm535_vm0, %v1106_v34, %v979_v17 }
 0x21d   : > { %v1011_v36 = vpop.permute.xlu0 %1010  ;;  %v996_v1 = vpop.permute.xlu1 %995 }
 0x21e   : > { %v1154_v58 = vsel %vm1152_vm10, %v1137_v40, %v1011_v36  ;;  %v1139_v2 = vsel %vm1135_vm9, %v1122_v0, %v996_v1 }
 0x21f   : > { %v1156_v47 = vsel %vm1152_vm10, %v1139_v2, %v1013_v24  ;;  %v1171_v25 = vsel %vm1169_vm11, %v1154_v58, %v1028_v18 }
 0x220   : > { %v1173_v19 = vsel %vm1169_vm11, %v1156_v47, %v1030_v14 }
 0x221   : > { %v1045_v7 = vpop.permute.xlu0 %1044  ;;  %v3051_v49 = vpop.permute.xlu1 %973  ;;  %v1190_v51 = vsel %vm1186_vm12, %v1173_v19, %v1047_v22 }
 0x222   : > { %v1188_v3 = vsel %vm1186_vm12, %v1171_v25, %v1045_v7 }
 0x223   : > { %1840 = vmatprep.mubr.msk.bf16.mxu1 %vm1230_vm13, %v1188_v3 }
 0x224   : > { %1841 = vmatmul.mubr.msk.bf16.vlgmr.msra.gmra.mxu1 %vm1230_vm13, %v1190_v51 }
 0x225   : > { %v940_v53 = vpop.permute.xlu0 %939  ;;  %v1034_v54 = vpop.permute.xlu1 %1033 }
 0x226   : > { %v1091_v56 = vsel %vm1085_vm7, %v1069_v46, %v940_v53  ;;  %v1751_v46 = vld [vmem:[%s3388_s27] ss:$0 sm:$0xff] }
 0x227   : > { %v1108_v44 = vsel %vm1102_vm8, %v1091_v56, %v964_v26 }
 0x228   : > { %v1124_v11 = vsel %vm535_vm0, %v1108_v44, %v981_v63 }
 0x229   : > { %v985_v16 = vpop.permute.xlu0 %984  ;;  %v922_v6 = vpop.permute.xlu1 %921  ;;  %v1141_v35 = vsel %vm1135_vm9, %v1124_v11, %v998_v29 }
 0x22a   : > { %v1078_v12 = vsel %vm1060_vm6, %v2831_v30, %v922_v6 }
 0x22d   : > { %v1032_v4 = vpop.permute.xlu0 %1031  ;;  %v983_v21 = vpop.permute.xlu1 %982 }
 0x231   : > { %v1051_v59 = vpop.permute.xlu0 %1050  ;;  %v920_v60 = vpop.permute.xlu1 %919 }
 0x235   : > { %v968_v37 = vpop.permute.xlu0 %967  ;;  %v1017_v48 = vpop.permute.xlu1 %1016 }
 0x239   : > { %v1002_v42 = vpop.permute.xlu0 %1001  ;;  %v946_v10 = vpop.permute.xlu1 %945 }
 0x23a   : > { %v1097_v14 = vsel %vm1085_vm7, %v1078_v12, %v946_v10 }
 0x23b   : > { %v1114_v18 = vsel %vm1102_vm8, %v1097_v14, %v3017_v45  ;;  %v1075_v45 = vsel %vm1060_vm6, %v2840_v38, %v920_v60 }
 0x23c   : > { %v1130_v22 = vsel %vm535_vm0, %v1114_v18, %v2998_v28 }
 0x23d   : > { %v1015_v50 = vpop.permute.xlu0 %1014  ;;  %v966_v17 = vpop.permute.xlu1 %965  ;;  %v1147_v8 = vsel %vm1135_vm9, %v1130_v22, %v3019_v9 }
 0x23e   : > { %v1158_v52 = vsel %vm1152_vm10, %v1141_v35, %v1015_v50  ;;  %v1110_v63 = vsel %vm1102_vm8, %v1093_v62, %v966_v17  ;;  %v1164_v38 = vsel %vm1152_vm10, %v1147_v8, %v3008_v41 }
 0x23f   : > { %v1175_v30 = vsel %vm1169_vm11, %v1158_v52, %v1032_v4  ;;  %v1126_v15 = vsel %vm535_vm0, %v1110_v63, %v983_v21  ;;  %v1181_v47 = vsel %vm1169_vm11, %v1164_v38, %v2987_v55 }
 0x240   : > { %v1198_v25 = vsel %vm1186_vm12, %v1181_v47, %v3015_v43 }
 0x241   : > { %v1049_v20 = vpop.permute.xlu0 %1048  ;;  %v1000_v24 = vpop.permute.xlu1 %999 }
 0x242   : > { %v1192_v23 = vsel %vm1186_vm12, %v1175_v30, %v1049_v20  ;;  %v1143_v26 = vsel %vm1135_vm9, %v1126_v15, %v1000_v24 }
 0x243   : > { %1844 = vmatprep.mubr.msk.bf16.mxu1 %vm1230_vm13, %v1192_v23  ;;  %v1160_v27 = vsel %vm1152_vm10, %v1143_v26, %v1017_v48 }
 0x244   : > { %v1177_v28 = vsel %vm1169_vm11, %v1160_v27, %v1034_v54 }
 0x245   : > { %v944_v29 = vpop.permute.xlu0 %943  ;;  %v991_v32 = vpop.permute.xlu1 %990  ;;  %v1194_v34 = vsel %vm1186_vm12, %v1177_v28, %v1051_v59 }
 0x246   : > { %v1095_v31 = vsel %vm1085_vm7, %v1075_v45, %v944_v29  ;;  %1845 = vmatmul.mubr.msk.bf16.gmra.mxu1 %vm1230_vm13, %v1194_v34 }
 0x247   : > { %v1112_v36 = vsel %vm1102_vm8, %v1095_v31, %v968_v37 }
 0x248   : > { %v1128_v40 = vsel %vm535_vm0, %v1112_v36, %v985_v16 }
 0x249   : > { %v1145_v58 = vsel %vm1135_vm9, %v1128_v40, %v1002_v42  ;;  %v1006_v9 = vpop.permute.xlu0 %1005  ;;  %v1008_v0 = vpop.permute.xlu1 %1007 }
 0x24a   : > { %v1162_v1 = vsel %vm1152_vm10, %v1145_v58, %v3021_v13 }
 0x24b   : > { %v1179_v2 = vsel %vm1169_vm11, %v1162_v1, %v3006_v39  ;;  %v1118_v39 = vsel %vm1102_vm8, %v3013_v5, %v3051_v49 }
 0x24c   : > { %v1196_v19 = vsel %vm1186_vm12, %v1179_v2, %v3029_v61  ;;  %v1134_v55 = vsel %vm535_vm0, %v1118_v39, %v991_v32  ;;  %v1149_v61 = vsel %vm1135_vm9, %v3037_v57, %v1006_v9  ;;  %v1372_v57 = vld [vmem:[%s3387_s21] sm:$0x3]  ;;  %s2129_s21 = scalar_lea.vmem %s3208_s14, 2048 }
 0x24d   : > { %v1023_v7 = vpop.permute.xlu0 %1022  ;;  %1848 = vmatprep.mubr.msk.bf16.mxu1 %vm1230_vm13, %v1196_v19  ;;  %v1025_v41 = vpop.permute.xlu1 %1024  ;;  %v1151_v51 = vsel %vm1135_vm9, %v1134_v55, %v1008_v0  ;;  %1877 = vmatprep.subr.msk.bf16.mxu0 %vm1247_vm5, %v1372_v57  ;;  %v1405_v21 = vsel %vm1247_vm5, %v1372_v57, 0  ;;  %p2130_p12 = scmp.ne.s32.totalorder %s3208_s14, %s2129_s21 }
 0x24e   : > { %1849 = vmatmul.mubr.msk.bf16.gmra.mxu1 %vm1230_vm13, %v1198_v25  ;;  %v1166_v53 = vsel %vm1152_vm10, %v1149_v61, %v1023_v7  ;;  %v1168_v54 = vsel %vm1152_vm10, %v1151_v51, %v1025_v41  ;;  %1857 = vmatpush3.bf16.msra.mxu0 %v1405_v21 }
 0x24f   : > { %p2131_p9 = pnand %p2130_p12, %p3392_p7 }
 0x251   : > { %v1040_v3 = vpop.permute.xlu0 %1039  ;;  %v1042_v13 = vpop.permute.xlu1 %1041  ;;  %p2132_p3 = pneg %p2131_p9 }
 0x252   : > { %v1183_v43 = vsel %vm1169_vm11, %v1166_v53, %v1040_v3  ;;  %v1185_v6 = vsel %vm1169_vm11, %v1168_v54, %v1042_v13 }
 0x255   : > { %v1057_v16 = vpop.permute.xlu0 %1056  ;;  %v1059_v5 = vpop.permute.xlu1 %1058 }
 0x256   : > { %v1200_v4 = vsel %vm1186_vm12, %v1183_v43, %v1057_v16  ;;  %v1202_v49 = vsel %vm1186_vm12, %v1185_v6, %v1059_v5  ;;  %v3139_v16 = vld [vmem:[%s3389_s3] ss:$0 sm:$0xff] }
 0x257   : > { %1852 = vmatprep.mubr.msk.bf16.mxu1 %vm1230_vm13, %v1200_v4 }
 0x258   : > { %1853 = vmatmul.mubr.msk.bf16.gmra.mxu1 %vm1230_vm13, %v1202_v49  ;;  %v2029_v49 = vld [vmem:[%s2617_s12 + $0x10] sm:$0xff] }
 0x2e4   : > { %v1842_v59 = vpop.f32.mrf.mxu1 }
 0x2e5   : > { %v1294_v44 = vadd.f32 %v1842_v59, %v1751_v46 }
 0x2e6   : > { %v1285_v60 = vpop.f32.mrf.mxu1 }
 0x2e7   : > { %v1286_v37 = vadd.f32 %v1751_v46, %v1285_v60  ;;  %v1350_v33 = vmax.f32 %v1294_v44, 0.0 }
 0x2e8   : > { %v1843_v56 = vpop.f32.mrf.mxu1 }
 0x2e9   : > { %v1297_v48 = vadd.f32 %v1843_v56, %v1751_v46  ;;  %v1348_v12 = vmax.f32 %v1286_v37, 0.0 }
 0x2ea   : > { %v1288_v42 = vpop.f32.mrf.mxu1 }
 0x2eb   : > { %v1289_v10 = vadd.f32 %v1751_v46, %v1288_v42  ;;  %v1351_v11 = vmax.f32 %v1297_v48, 0.0  ;;  %v2031_v42 = vld [vmem:[%s2617_s12 + $0x18] sm:$0xff] }
 0x2ed   : > { %v1349_v14 = vmax.f32 %v1289_v10, 0.0  ;;  %v1365_v35 = vpack.c.bf16 %v1351_v11, %v1350_v33 }
 0x2ef   : > { %v1364_v50 = vpack.c.bf16 %v1349_v14, %v1348_v12  ;;  %v2032_v14 = vld [vmem:[%s2617_s12 + $0x8] sm:$0xff] }
 0x2f1   : > { %1858 = vmatprep.mubr.msk.bf16.mxu0 %vm1060_vm6, %v1364_v50 }
 0x2f2   : > { %1859 = vmatmul.mubr.msk.bf16.vlgmr.msra.gmra.mxu0 %vm1060_vm6, %v1365_v35 }
 0x306   : > { %v1846_v62 = vpop.f32.mrf.mxu1 }
 0x307   : > { %v1310_v20 = vadd.f32 %v1846_v62, %v1751_v46 }
 0x308   : > { %v1301_v52 = vpop.f32.mrf.mxu1 }
 0x309   : > { %v1302_v18 = vadd.f32 %v1751_v46, %v1301_v52  ;;  %v1354_v27 = vmax.f32 %v1310_v20, 0.0 }
 0x30a   : > { %v1847_v17 = vpop.f32.mrf.mxu1 }
 0x30b   : > { %v1313_v63 = vadd.f32 %v1847_v17, %v1751_v46  ;;  %v1352_v24 = vmax.f32 %v1302_v18, 0.0  ;;  %v2033_v17 = vld [vmem:[%s2617_s12 + $0x30] sm:$0xff] }
 0x30c   : > { %v1304_v30 = vpop.f32.mrf.mxu1 }
 0x30d   : > { %v1305_v22 = vadd.f32 %v1751_v46, %v1304_v30  ;;  %v1355_v23 = vmax.f32 %v1313_v63, 0.0 }
 0x30e   : > { %v1850_v15 = vpop.f32.mrf.mxu1 }
 0x30f   : > { %v1353_v26 = vmax.f32 %v1305_v22, 0.0  ;;  %v1367_v29 = vpack.c.bf16 %v1355_v23, %v1354_v27  ;;  %v1326_v34 = vadd.f32 %v1850_v15, %v1751_v46  ;;  %v2034_v22 = vld [vmem:[%s2617_s12 + $0x20] sm:$0xff]  ;;  %v2035_v27 = vld [vmem:[%s2617_s12 + $0x38] sm:$0xff] }
 0x310   : > { %v1317_v45 = vpop.f32.mrf.mxu1 }
 0x311   : > { %v1366_v8 = vpack.c.bf16 %v1353_v26, %v1352_v24  ;;  %v1318_v31 = vadd.f32 %v1751_v46, %v1317_v45  ;;  %v1358_v1 = vmax.f32 %v1326_v34, 0.0 }
 0x312   : > { %v1851_v28 = vpop.f32.mrf.mxu1 }
 0x313   : > { %v1329_v32 = vadd.f32 %v1851_v28, %v1751_v46  ;;  %1862 = vmatprep.mubr.msk.bf16.mxu0 %vm1060_vm6, %v1366_v8  ;;  %v1356_v58 = vmax.f32 %v1318_v31, 0.0  ;;  %v2036_v31 = vld [vmem:[%s2617_s12 + $0x28] sm:$0xff] }
 0x314   : > { %v1320_v36 = vpop.f32.mrf.mxu1  ;;  %1863 = vmatmul.mubr.msk.bf16.gmra.mxu0 %vm1060_vm6, %v1367_v29 }
 0x315   : > { %v1321_v40 = vadd.f32 %v1751_v46, %v1320_v36  ;;  %v1359_v38 = vmax.f32 %v1329_v32, 0.0 }
 0x317   : > { %v1357_v9 = vmax.f32 %v1321_v40, 0.0  ;;  %v1369_v19 = vpack.c.bf16 %v1359_v38, %v1358_v1  ;;  %v2037_v38 = vld [vmem:[%s2617_s12 + $0x50] sm:$0xff] }
 0x318   : > { %v1854_v0 = vpop.f32.mrf.mxu1 }
 0x319   : > { %v1368_v2 = vpack.c.bf16 %v1357_v9, %v1356_v58  ;;  %v1342_v3 = vadd.f32 %v1854_v0, %v1751_v46 }
 0x31a   : > { %v1333_v47 = vpop.f32.mrf.mxu1 }
 0x31b   : > { %1866 = vmatprep.mubr.msk.bf16.mxu0 %vm1060_vm6, %v1368_v2  ;;  %v1334_v41 = vadd.f32 %v1751_v46, %v1333_v47  ;;  %v1362_v53 = vmax.f32 %v1342_v3, 0.0  ;;  %v2038_v2 = vld [vmem:[%s2617_s12 + $0x40] sm:$0xff] }
 0x31c   : > { %v1855_v7 = vpop.f32.mrf.mxu1  ;;  %1867 = vmatmul.mubr.msk.bf16.gmra.mxu0 %vm1060_vm6, %v1369_v19 }
 0x31d   : > { %v1345_v25 = vadd.f32 %v1855_v7, %v1751_v46  ;;  %v1360_v61 = vmax.f32 %v1334_v41, 0.0 }
 0x31e   : > { %v1336_v39 = vpop.f32.mrf.mxu1 }
 0x31f   : > { %v1337_v13 = vadd.f32 %v1751_v46, %v1336_v39  ;;  %v1363_v55 = vmax.f32 %v1345_v25, 0.0  ;;  %v2030_v46 = vld [vmem:[%s2617_s12] sm:$0xff]  ;;  %v2039_v25 = vld [vmem:[%s2617_s12 + $0x58] sm:$0xff] }
 0x321   : > { %v1361_v51 = vmax.f32 %v1337_v13, 0.0  ;;  %v1371_v43 = vpack.c.bf16 %v1363_v55, %v1362_v53  ;;  %v2040_v55 = vld [vmem:[%s2617_s12 + $0x48] sm:$0xff] }
 0x323   : > { %v1370_v54 = vpack.c.bf16 %v1361_v51, %v1360_v61 }
 0x325   : > { %1870 = vmatprep.mubr.msk.bf16.mxu0 %vm1060_vm6, %v1370_v54 }
 0x326   : > { %1871 = vmatmul.mubr.msk.bf16.gmra.mxu0 %vm1060_vm6, %v1371_v43 }
 0x3b2   : > { %v1860_v6 = vpop.f32.mrf.mxu0 }
 0x3b3   : > { %v1450_v4 = vadd.f32 %v1860_v6, %v3139_v16  ;;  %v2041_v6 = vld [vmem:[%s2617_s12 + $0x70] sm:$0xff] }
 0x3b4   : > { %v1441_v5 = vpop.f32.mrf.mxu0 }
 0x3b5   : > { %v1506_v57 = vadd.f32 %v2029_v49, %v1450_v4  ;;  %v1442_v21 = vadd.f32 %v3139_v16, %v1441_v5 }
 0x3b6   : > { %v1861_v59 = vpop.f32.mrf.mxu0 }
 0x3b7   : > { %v1522_v60 = vmax.f32 %v1506_v57, 0.0  ;;  %v1504_v56 = vadd.f32 %v2030_v46, %v1442_v21  ;;  %v1453_v37 = vadd.f32 %v1861_v59, %v3139_v16  ;;  %v2042_v21 = vld [vmem:[%s2617_s12 + $0x60] sm:$0xff] }
 0x3b8   : > { %v1444_v48 = vpop.f32.mrf.mxu0 }
 0x3b9   : > { %1538 = vst.msk [vmem:[%s3148_s30 + $0x10] sm:$0xff] %vm535_vm0, %v1522_v60  ;;  %v1520_v44 = vmax.f32 %v1504_v56, 0.0  ;;  %v1507_v10 = vadd.f32 %v2031_v42, %v1453_v37  ;;  %v1445_v11 = vadd.f32 %v3139_v16, %v1444_v48  ;;  %v2043_v37 = vld [vmem:[%s2617_s12 + $0x78] sm:$0xff] }
 0x3bb   : > { %1536 = vst.msk [vmem:[%s3148_s30] sm:$0xff] %vm535_vm0, %v1520_v44  ;;  %v1523_v12 = vmax.f32 %v1507_v10, 0.0  ;;  %v1505_v33 = vadd.f32 %v2032_v14, %v1445_v11  ;;  %v2044_v10 = vld [vmem:[%s2617_s12 + $0x68] sm:$0xff]  ;;  %s2296_s12 = smov [#allocation8]  }
 0x3bc   : > { %s2133_s9 = sshll.u32 %s2296_s12, 4  ;;  %s2134_s9 = int_to_ptr.vmem [resolvable:$false] %s2133_s9 }
 0x3bd   : > { %1539 = vst.msk [vmem:[%s3148_s30 + $0x18] sm:$0xff] %vm535_vm0, %v1523_v12  ;;  %v1521_v50 = vmax.f32 %v1505_v33, 0.0  ;;  %s2135_s17 = scalar_lea.vmem %s2134_s9, 4096  ;;  %p2136_p1 = scmp.lt.s32.totalorder %s3208_s14, %s2134_s9 }
 0x3be   : > { %p2137_p8 = scmp.lt.s32.totalorder %s2135_s17, %s2129_s21 }
 0x3bf   : > { %1537 = vst.msk [vmem:[%s3148_s30 + $0x8] sm:$0xff] %vm535_vm0, %v1521_v50 }
 0x3c0   : > { %p2138_p5 = por %p2137_p8, %p2136_p1 }
 0x3c2   : > { %p2139_p6 = pnand %p2138_p5, %p2132_p3 }
 0x3d4   : > { %v1864_v35 = vpop.f32.mrf.mxu0 }
 0x3d5   : > { %v1466_v62 = vadd.f32 %v1864_v35, %v3139_v16 }
 0x3d6   : > { %v1457_v52 = vpop.f32.mrf.mxu0 }
 0x3d7   : > { %v1510_v18 = vadd.f32 %v2033_v17, %v1466_v62  ;;  %v1458_v63 = vadd.f32 %v3139_v16, %v1457_v52 }
 0x3d8   : > { %v1865_v20 = vpop.f32.mrf.mxu0 }
 0x3d9   : > { %v1526_v30 = vmax.f32 %v1510_v18, 0.0  ;;  %v1508_v23 = vadd.f32 %v2034_v22, %v1458_v63  ;;  %v1469_v15 = vadd.f32 %v1865_v20, %v3139_v16 }
 0x3da   : > { %v1460_v24 = vpop.f32.mrf.mxu0 }
 0x3db   : > { %1542 = vst.msk [vmem:[%s3148_s30 + $0x30] sm:$0xff] %vm535_vm0, %v1526_v30  ;;  %v1524_v26 = vmax.f32 %v1508_v23, 0.0  ;;  %v1511_v45 = vadd.f32 %v2035_v27, %v1469_v15  ;;  %v1461_v8 = vadd.f32 %v3139_v16, %v1460_v24 }
 0x3dc   : > { %v1868_v29 = vpop.f32.mrf.mxu0 }
 0x3dd   : > { %1540 = vst.msk [vmem:[%s3148_s30 + $0x20] sm:$0xff] %vm535_vm0, %v1524_v26  ;;  %v1527_v28 = vmax.f32 %v1511_v45, 0.0  ;;  %v1509_v32 = vadd.f32 %v2036_v31, %v1461_v8  ;;  %v1482_v34 = vadd.f32 %v1868_v29, %v3139_v16 }
 0x3de   : > { %v1473_v36 = vpop.f32.mrf.mxu0 }
 0x3df   : > { %1543 = vst.msk [vmem:[%s3148_s30 + $0x38] sm:$0xff] %vm535_vm0, %v1527_v28  ;;  %v1525_v40 = vmax.f32 %v1509_v32, 0.0  ;;  %v1514_v58 = vadd.f32 %v2037_v38, %v1482_v34  ;;  %v1474_v9 = vadd.f32 %v3139_v16, %v1473_v36 }
 0x3e0   : > { %v1869_v0 = vpop.f32.mrf.mxu0 }
 0x3e1   : > { %1541 = vst.msk [vmem:[%s3148_s30 + $0x28] sm:$0xff] %vm535_vm0, %v1525_v40  ;;  %v1530_v1 = vmax.f32 %v1514_v58, 0.0  ;;  %v1512_v47 = vadd.f32 %v2038_v2, %v1474_v9  ;;  %v1485_v19 = vadd.f32 %v1869_v0, %v3139_v16 }
 0x3e2   : > { %v1476_v7 = vpop.f32.mrf.mxu0 }
 0x3e3   : > { %1546 = vst.msk [vmem:[%s3148_s30 + $0x50] sm:$0xff] %vm535_vm0, %v1530_v1  ;;  %v1528_v41 = vmax.f32 %v1512_v47, 0.0  ;;  %v1515_v3 = vadd.f32 %v2039_v25, %v1485_v19  ;;  %v1477_v39 = vadd.f32 %v3139_v16, %v1476_v7 }
 0x3e5   : > { %1544 = vst.msk [vmem:[%s3148_s30 + $0x40] sm:$0xff] %vm535_vm0, %v1528_v41  ;;  %v1531_v13 = vmax.f32 %v1515_v3, 0.0  ;;  %v1513_v61 = vadd.f32 %v2040_v55, %v1477_v39 }
 0x3e6   : > { %v1872_v51 = vpop.f32.mrf.mxu0 }
 0x3e7   : > { %v1498_v53 = vadd.f32 %v1872_v51, %v3139_v16  ;;  %1547 = vst.msk [vmem:[%s3148_s30 + $0x58] sm:$0xff] %vm535_vm0, %v1531_v13  ;;  %v1529_v54 = vmax.f32 %v1513_v61, 0.0 }
 0x3e8   : > { %v1489_v43 = vpop.f32.mrf.mxu0 }
 0x3e9   : > { %v1518_v4 = vadd.f32 %v2041_v6, %v1498_v53  ;;  %v1490_v5 = vadd.f32 %v3139_v16, %v1489_v43  ;;  %1545 = vst.msk [vmem:[%s3148_s30 + $0x48] sm:$0xff] %vm535_vm0, %v1529_v54 }
 0x3ea   : > { %v1873_v49 = vpop.f32.mrf.mxu0 }
 0x3eb   : > { %v1534_v57 = vmax.f32 %v1518_v4, 0.0  ;;  %v1516_v59 = vadd.f32 %v2042_v21, %v1490_v5  ;;  %v1501_v60 = vadd.f32 %v1873_v49, %v3139_v16 }
 0x3ec   : > { %v1492_v46 = vpop.f32.mrf.mxu0 }
 0x3ed   : > { %1550 = vst.msk [vmem:[%s3148_s30 + $0x70] sm:$0xff] %vm535_vm0, %v1534_v57  ;;  %v1532_v56 = vmax.f32 %v1516_v59, 0.0  ;;  %v1519_v48 = vadd.f32 %v2043_v37, %v1501_v60  ;;  %v1493_v44 = vadd.f32 %v3139_v16, %v1492_v46 }
 0x3ef   : > { %1548 = vst.msk [vmem:[%s3148_s30 + $0x60] sm:$0xff] %vm535_vm0, %v1532_v56  ;;  %v1535_v42 = vmax.f32 %v1519_v48, 0.0  ;;  %v1517_v11 = vadd.f32 %v2044_v10, %v1493_v44 }
 0x3f1   : > { %1551 = vst.msk [vmem:[%s3148_s30 + $0x78] sm:$0xff] %vm535_vm0, %v1535_v42  ;;  %v1533_v12 = vmax.f32 %v1517_v11, 0.0 }
 0x3f3   : > { %1549 = vst.msk [vmem:[%s3148_s30 + $0x68] sm:$0xff] %vm535_vm0, %v1533_v12 }
 0x3f4   : > { %2142 = shalt.err (!%p2139_p6)
}
 0x3f5   : > { %s2143_s27 = scalar_lea.hbm %s3215_s24, 2048  ;;  %s2147_s3 = scalar_lea.hbm %s3391_s25, 8192 }
 0x3f6   : > { %p2144_p10 = scmp.ne.s32.totalorder %s3215_s24, %s2143_s27  ;;  %p2148_p2 = scmp.lt.s32.totalorder %s3215_s24, %s3391_s25 }
 0x3f7   : > { %p2149_p11 = scmp.lt.s32.totalorder %s2147_s3, %s2143_s27 }
 0x3f8   : > { %p2145_p13 = pnand %p2144_p10, %p3392_p7 }
 0x3f9   : > { %p2150_p4 = por %p2149_p11, %p2148_p2 }
 0x3fa   : > { %p2146_p0 = pneg %p2145_p13 }
 0x3fc   : > { %p2151_p12 = pnand %p2150_p4, %p2146_p0 }
 0x3fe   : > { %2154 = shalt.err (!%p2151_p12)
}
 0x3ff   : > { %s2297_s5 = smov 128  }
 0x400   : > { %1884 = dma.vmem_to_hbm [thread:$0]  (%p3392_p7), %s3208_s14, 2048, %s3215_s24, %s1553_s20, %s2297_s5, %s2297_s5, %s2291_s28  }
 0x401 PF: > { %p1901_p9 = scmp.ge.s32.totalorder %s2281_s22, 2  ;;  %s1584_s1 = sand.u32 1, %s2253_s15  }
 0x402   : > { %p3393_p3 = scmp.ne.s32.totalorder %s3359_s6, 0  ;;  %s1585_s19 = scalar_lea.sflag [#allocation4], %s1584_s1 }
 0x404   : > { %p1897_p1 = pnand %p1901_p9, %p3393_p3 }
 0x406   : > { %p1898_p8 = pneg %p1897_p1 }
 0x408   : > { %2224 = dma.done.wait (%p1898_p8), %s1585_s19, 2048  }
 0x409   : > { %2226 = vsyncadd (%p1898_p8), %s1585_s19, 4294965248  ;;  %s28_s22 = sadd.s32 1, %s2281_s22   ;;  %s3395_s12 = sld [smem:[#allocation13_spill]] }
 0x40a   : > { %p3248_p5 = scmp.ge.s32.totalorder %s28_s22, 6   ;;  %s3396_s13 = sld [smem:[#allocation14_spill]] }
 0x40b   : > { %s3397_s14 = sld [smem:[#allocation24_spill]]  ;;  %s3404_s30 = smov %s2233_s10 }
 0x40c   : > { %s3398_s0 = sld [smem:[#allocation15_spill]]  ;;  %s3405_s10 = smov %s2237_s11 }
 0x40d   : > { %s3399_s17 = sld [smem:[#allocation25_spill]]  ;;  %s3406_s11 = smov %s2586_s7 }
 0x40e   : > { %s3400_s18 = sld [smem:[#allocation18_spill]]  ;;  %s3407_s15 = smov %s2257_s16 }
 0x40f   : > { %s3401_s19 = sld [smem:[#allocation19_spill]]  ;;  %27 = sbr.rel (!%p3248_p5) target bundleno = 23 (0x17), region = 125 }
 0x410   : > { %s3402_s20 = sld [smem:[#allocation20_spill]] }
 0x411   : > { %s3403_s21 = sld [smem:[#allocation21_spill]] }
 0x412   : > { %s3408_s16 = smov %s3398_s0 }
 0x414   :  { %1590 = vsyncpa [#allocation3], 1 }
 0x415   :  { %1592 = vsyncpa [#allocation3 + $0x1], 1 }
 0x416   :  { %1593 = vsyncpa [#allocation6], 1 }
 0x417   :  { %1595 = vsyncpa [#allocation6 + $0x1], 1 }
 0x418   :  { %1596 = vsyncpa [#allocation4], 1 }
 0x419   :  { %1598 = vsyncpa [#allocation4 + $0x1], 1 }

</bundles_post_ra>
